<compile_context>
chip_gen: v7x
topology: tpu7x:2x2x1
jax: 0.10.0
libtpu: 0.0.40
codegen_flags: <defaults>
</compile_context>

<pallas_src>
import math

import jax
import jax.numpy as jnp
from jax import lax
from jax.experimental import pallas as pl
from jax.experimental.pallas import tpu as pltpu

MXU_DTYPE = jnp.bfloat16     # matmul-operand dtype (accumulation is f32)
LANE = 128
K_TOP = 5


# ----------------------------------------------------------------------------
# helpers
# ----------------------------------------------------------------------------
def _layer_norm(x, g, b, eps=1e-5):
    mu = jnp.mean(x, axis=-1, keepdims=True)
    var = jnp.mean((x - mu) ** 2, axis=-1, keepdims=True)
    return (x - mu) * lax.rsqrt(var + eps) * g + b


def _is_single_core_chip():
    """Best effort: v5e/v6e have one TensorCore per chip (grid>=2 not needed)."""
    try:
        kind = jax.devices()[0].device_kind.lower()
    except Exception:
        return False
    return ("lite" in kind) or ("v5e" in kind) or ("v6e" in kind)


def _pick_batch_tile(batch, L, D, h, qd, act_budget_bytes=24 << 20,
                     prefer_multi_tile=True):
    """Largest divisor of `batch` whose activation footprint fits the budget.

    On multi-TensorCore chips we additionally prefer >=2 grid steps on the
    (parallel) batch axis so megacore sharding has something to split.
    """
    hq = h * qd

    def act_bytes(bt):
        n = bt * L
        return 4 * (2 * bt * L * L          # per-head scores + probs
                    + 3 * n * hq            # qkv (f32 + bf16) + ctx
                    + 7 * n * D)            # x2 / residuals / ffn temps

    divisors = [d for d in range(1, batch + 1) if batch % d == 0]
    fitting = [d for d in divisors if act_bytes(d) <= act_budget_bytes] or [1]
    bt = max(fitting)
    if prefer_multi_tile and batch // bt < 2:
        smaller = [d for d in fitting if batch // d >= 2]
        if smaller:
            bt = max(smaller)
    return bt


def _estimate_vmem_bytes(bt, L, D, dh, ds, h, qd, P):
    """Rough VMEM footprint (streamed weights x2 buffers + activations)."""
    n, hq = bt * L, h * qd
    f32b, b16 = 4, 2
    per_layer_w = (D * 3 * hq + hq * D + 2 * D * D) * b16 + (3 * hq + 7 * D) * f32b
    const_w = ((2 * D + 3 * dh + 4 * D + P) * f32b
               + (dh * D + ds * D + D * D + K_TOP * D * D + D * P) * b16)
    data_in = (2 * n + n * D + bt * L + bt * ds) * f32b
    scratch = n * D * f32b
    temps = (3 * n * hq + 2 * bt * L * L + n * hq + 7 * n * D) * f32b
    return int(2 * (per_layer_w + data_in) + const_w + scratch + temps)


# ----------------------------------------------------------------------------
# fused forward kernel: grid = (batch_tiles, n_layers)
# ----------------------------------------------------------------------------
def _make_fused_kernel(*, d_model, q, h, seq_len, bt, p_out):
    D, L, qd = d_model, seq_len, q
    n = bt * L                    # flattened (batch-tile * seq) rows
    hq = h * qd
    f32 = jnp.float32

    def kernel(t_ref, v_ref, key_ref, mask_ref, static_ref,
               pe_ref, cw1t_ref, cb1_ref, cw2t_ref, cb2_ref,
               sw1t_ref, sw2t_ref, hv_ref, mw_ref, owt_ref, ob_ref,
               wqkv_ref, bqkv_ref, wo_ref, wff_ref, encv_ref,
               out_ref, x2_ref):
        layer = pl.program_id(1)
        last = pl.num_programs(1) - 1

        # ---------- frontend (layer 0 only): 1x1-conv stack + embedding + PE
        @pl.when(layer == 0)
        def _():
            tcol = t_ref[...].reshape(n, 1)
            vcol = v_ref[...].reshape(n, 1)
            w1t = cw1t_ref[...]                                  # (2, d_hidden)
            hmid = jnp.maximum(tcol * w1t[0:1, :] + vcol * w1t[1:2, :]
                               + cb1_ref[...], 0.0)              # (n, d_hidden)
            val = jnp.dot(hmid.astype(MXU_DTYPE), cw2t_ref[...],
                          preferred_element_type=f32) + cb2_ref[...]   # (n, D)
            freq = pe_ref[0:1, :]                                # (1, D)
            even = pe_ref[1:2, :]                                # (1, D)
            angle = tcol * freq
            pe = even * jnp.sin(angle) + (1.0 - even) * jnp.cos(angle)
            x2_ref[...] = val + key_ref[...].reshape(n, D) + pe

        # key-padding additive bias: 0 where valid, -1e30 where padded
        neg = (mask_ref[...] - 1.0) * 1e30                       # (bt, 1, L)

        # ---------- one encoder layer (weights streamed along grid axis 1)
        x2 = x2_ref[...]
        xb = x2.astype(MXU_DTYPE)

        # fused lane-dense QKV projection (scale folded into W_q / b_q)
        qkv = (jnp.dot(xb, wqkv_ref[0], preferred_element_type=f32)
               + bqkv_ref[0]).astype(MXU_DTYPE)                  # (n, 3*h*q)
        qkv3 = qkv.reshape(bt, L, 3 * hq)

        # per-head scores / PV (static lane slices; only one (bt,L,L) score
        # tensor live at a time, probabilities cast to bf16 before PV)
        ctx_heads = []
        for hd in range(h):
            Qi = qkv3[..., hd * qd:(hd + 1) * qd]
            Ki = qkv3[..., hq + hd * qd:hq + (hd + 1) * qd]
            Vi = qkv3[..., 2 * hq + hd * qd:2 * hq + (hd + 1) * qd]
            s = jnp.einsum('blq,bmq->blm', Qi, Ki,
                           preferred_element_type=f32)           # (bt, L, L)
            s = s + neg
            s = s - jnp.max(s, axis=-1, keepdims=True)
            s = jnp.exp(s)
            p = (s * pl.reciprocal(jnp.sum(s, axis=-1, keepdims=True),
                                   approx=True)).astype(MXU_DTYPE)
            ctx_heads.append(jnp.einsum('blm,bmq->blq', p, Vi,
                                        preferred_element_type=f32))
        ctx = (jnp.concatenate(ctx_heads, axis=-1)
               .astype(MXU_DTYPE).reshape(n, hq))                # (n, h*q)

        # fused output projection (head-sum folded into the contraction)
        a2 = jnp.dot(ctx, wo_ref[0], preferred_element_type=f32) + encv_ref[0, 0]
        y2 = _layer_norm(a2 + x2, encv_ref[0, 3], encv_ref[0, 4])

        ff = jnp.maximum(jnp.dot(y2.astype(MXU_DTYPE), wff_ref[0, 0],
                                 preferred_element_type=f32) + encv_ref[0, 1], 0.0)
        ff = jnp.dot(ff.astype(MXU_DTYPE), wff_ref[0, 1],
                     preferred_element_type=f32) + encv_ref[0, 2]
        x2_new = _layer_norm(ff + y2, encv_ref[0, 5], encv_ref[0, 6])
        x2_ref[...] = x2_new

        # ---------- head (last layer only): static FFN + top-5 + MLP + sigmoid
        @pl.when(layer == last)
        def _():
            s_in = static_ref[...].reshape(bt, -1)
            hs = jnp.maximum(jnp.dot(s_in.astype(MXU_DTYPE), sw1t_ref[...],
                                     preferred_element_type=f32) + hv_ref[0], 0.0)
            hs = jnp.dot(hs.astype(MXU_DTYPE), sw2t_ref[...],
                         preferred_element_type=f32) + hv_ref[1]  # (bt, D)

            # top-5 per channel over time (iterative max; first-occurrence
            # masking matches torch.topk duplicate-value behaviour).
            # NOTE: padded timesteps are NOT excluded (matches the reference).
            work = x2_new.reshape(bt, L, D)
            tidx = lax.broadcasted_iota(jnp.int32, (bt, L, D), 1)
            curs = []
            for kk in range(K_TOP):
                cur = jnp.max(work, axis=1)                      # (bt, D)
                curs.append(cur)
                if kk + 1 < K_TOP:
                    hit = work == cur[:, None, :]
                    first = jnp.min(jnp.where(hit, tidx, L), axis=1)
                    work = jnp.where(tidx == first[:, None, :], -jnp.inf, work)
            top = jnp.concatenate(curs, axis=-1)                 # (bt, 5D) k-major

            acc = hs + hv_ref[2] + jnp.dot(top.astype(MXU_DTYPE), mw_ref[...],
                                           preferred_element_type=f32)
            logits = (jnp.dot(acc.astype(MXU_DTYPE), owt_ref[...],
                              preferred_element_type=f32) + ob_ref[...])
            prob = 1.0 / (1.0 + jnp.exp(-logits))                # exact sigmoid
            out_ref[...] = prob.reshape(bt, 1, p_out)

    return kernel


# ----------------------------------------------------------------------------
# wrapper: one pallas_call, grid = (batch tiles, layers)
# ----------------------------------------------------------------------------
def apricott_forward(x, static, packed, *, d_model, q, h, n_layers, d_output,
                     act_budget_bytes=24 << 20):
    B, L, _ = x.shape
    d_static = static.shape[-1]
    d_hidden = packed["cw1t"].shape[1]
    P = packed["owt"].shape[1]                    # lane-padded output width
    assert L >= K_TOP, "sequence length must be >= 5 (torch.topk k=5)"

    # glue kept in plain JAX: embedding gather + padding mask + input unpack
    variables = x[:, :, 1].astype(jnp.int32)
    key = jnp.take(packed["emb"], variables, axis=0)              # (B, L, D)
    maskv = (variables != 0).astype(jnp.float32).reshape(B, 1, L)
    times = x[:, :, 0:1]                                          # (B, L, 1)
    vals = x[:, :, 2:3]                                           # (B, L, 1)
    static3 = static.reshape(B, 1, d_static)

    bt = _pick_batch_tile(B, L, d_model, h, q,
                          act_budget_bytes=act_budget_bytes,
                          prefer_multi_tile=not _is_single_core_chip())
    grid = (B // bt, n_layers)

    kernel = _make_fused_kernel(d_model=d_model, q=q, h=h, seq_len=L,
                                bt=bt, p_out=P)

    def batch_spec(shape):
        nd = len(shape)
        return pl.BlockSpec((bt,) + tuple(shape[1:]),
                            lambda b, l: (b,) + (0,) * (nd - 1))

    def const_spec(arr):
        nd = arr.ndim
        # NOTE: these blocks never change across the grid; they could be
        # single-buffered with pipeline_mode=pl.Buffered(1) (left default
        # for portability -- they are small).
        return pl.BlockSpec(arr.shape, lambda b, l: (0,) * nd)

    def layer_spec(arr):
        nd = arr.ndim
        return pl.BlockSpec((1,) + tuple(arr.shape[1:]),
                            lambda b, l: (l,) + (0,) * (nd - 1))

    const_names = ("pe", "cw1t", "cb1", "cw2t", "cb2",
                   "sw1t", "sw2t", "hv", "mw", "owt", "ob")
    layer_names = ("wqkv", "bqkv", "wo", "wff", "encv")
    const_ws = [packed[k] for k in const_names]
    layer_ws = [packed[k] for k in layer_names]

    in_specs = ([batch_spec(times.shape), batch_spec(vals.shape),
                 batch_spec(key.shape), batch_spec(maskv.shape),
                 batch_spec(static3.shape)]
                + [const_spec(w) for w in const_ws]
                + [layer_spec(w) for w in layer_ws])

    vmem_est = _estimate_vmem_bytes(bt, L, d_model, d_hidden, d_static, h, q, P)
    vmem_limit = int(min(max(int(1.5 * vmem_est), 32 << 20), 60 << 20))

    out = pl.pallas_call(
        kernel,
        out_shape=jax.ShapeDtypeStruct((B, 1, P), jnp.float32),
        grid=grid,
        in_specs=in_specs,
        out_specs=pl.BlockSpec((bt, 1, P), lambda b, l: (b, 0, 0)),
        scratch_shapes=[pltpu.VMEM((bt * L, d_model), jnp.float32)],
        compiler_params=pltpu.CompilerParams(
            dimension_semantics=("parallel", "arbitrary"),
            vmem_limit_bytes=vmem_limit),
    )(times, vals, key, maskv, static3, *const_ws, *layer_ws)
    return out.reshape(B, P)[:, :d_output]


# ----------------------------------------------------------------------------
# parameter init (torch-like layout) and packing into the kernel layout
# ----------------------------------------------------------------------------
def init_params(key, d_model, d_hidden, d_static, max_code, d_output, q, h, N):
    keys = iter(jax.random.split(key, 64 + 16 * N))

    def w(shape, s=0.1):
        return jax.random.normal(next(keys), shape, jnp.float32) * s

    qh = q * h
    params = dict(
        cw1=w((d_hidden, 2)), cb1=w((d_hidden,)),          # Conv1d(2, dh, 1)
        cw2=w((d_model, d_hidden)), cb2=w((d_model,)),     # Conv1d(dh, D, 1)
        emb=w((max_code + 1, d_model)),                    # Embedding
        sw1=w((d_model, d_static)), sb1=w((d_model,)),     # ffn_static
        sw2=w((d_model, d_model)), sb2=w((d_model,)),
        mw=w((d_model, K_TOP * d_model)), mb=w((d_model,)),  # mlp Linear(5D,D)
        ow=w((d_output, d_model)), ob=w((d_output,)),      # d_output heads
    )
    enc = []
    for _ in range(N):
        enc.append(dict(
            wq=w((qh, d_model)), bq=w((qh,)),
            wk=w((qh, d_model)), bk=w((qh,)),
            wv=w((qh, d_model)), bv=w((qh,)),
            wo=w((d_model, qh)), bo=w((d_model,)),
            wc1=w((d_model, d_model)), bc1=w((d_model,)),
            wc2=w((d_model, d_model)), bc2=w((d_model,)),
            g1=jnp.ones((d_model,), jnp.float32),
            be1=jnp.zeros((d_model,), jnp.float32),
            g2=jnp.ones((d_model,), jnp.float32),
            be2=jnp.zeros((d_model,), jnp.float32),
        ))
    params["enc"] = enc
    return params


def pack_params(p, *, d_model, q, h, d_output, mxu_dtype=MXU_DTYPE):
    """Pre-transpose / stack / pack weights into the fused-kernel layout."""
    D = d_model
    hq = h * q
    P = ((d_output + LANE - 1) // LANE) * LANE
    inv_sqrt_q = 1.0 / math.sqrt(q)

    wqkv, bqkv, wo, wff, encv = [], [], [], [], []
    for lp in p["enc"]:
        # 1/sqrt(q) attention scale folded into the Q projection at pack time
        wqkv.append(jnp.concatenate([lp["wq"].T * inv_sqrt_q,
                                     lp["wk"].T, lp["wv"].T], axis=1))  # (D,3hq)
        bqkv.append(jnp.concatenate([lp["bq"] * inv_sqrt_q,
                                     lp["bk"], lp["bv"]]).reshape(1, 3 * hq))
        wo.append(lp["wo"].T)                                           # (hq, D)
        wff.append(jnp.stack([lp["wc1"].T, lp["wc2"].T], axis=0))       # (2, D, D)
        encv.append(jnp.stack([lp["bo"], lp["bc1"], lp["bc2"],
                               lp["g1"], lp["be1"], lp["g2"], lp["be2"]],
                              axis=0).reshape(7, 1, D))                 # (7, 1, D)

    # sinusoidal-PE constants (hoisted out of the kernel)
    j = jnp.arange(D)
    freq = jnp.exp((2 * (j // 2)).astype(jnp.float32) * (-math.log(10000.0) / D))
    even = (j % 2 == 0).astype(jnp.float32)
    pe_const = jnp.stack([freq, even], axis=0)                          # (2, D)

    # mlp Linear(5D, D): repack so input index = kk*D + channel, matching the
    # in-kernel lane concat of the five per-channel top values.
    mw2 = jnp.transpose(p["mw"].reshape(D, D, K_TOP), (2, 1, 0)).reshape(K_TOP * D, D)

    # output heads, lane-padded to P for dense stores
    owt = jnp.zeros((D, P), jnp.float32).at[:, :d_output].set(p["ow"].T)
    obp = jnp.zeros((1, P), jnp.float32).at[0, :d_output].set(p["ob"])

    return dict(
        emb=p["emb"],
        pe=pe_const,
        cw1t=p["cw1"].T,                                  # (2, d_hidden) f32
        cb1=p["cb1"].reshape(1, -1),
        cw2t=p["cw2"].T.astype(mxu_dtype),                # (d_hidden, D)
        cb2=p["cb2"].reshape(1, D),
        sw1t=p["sw1"].T.astype(mxu_dtype),                # (d_static, D)
        sw2t=p["sw2"].T.astype(mxu_dtype),                # (D, D)
        hv=jnp.stack([p["sb1"], p["sb2"], p["mb"]]).reshape(3, 1, D),
        mw=mw2.astype(mxu_dtype),                         # (5D, D)
        owt=owt.astype(mxu_dtype),                        # (D, P)
        ob=obp,                                           # (1, P)
        wqkv=jnp.stack(wqkv).astype(mxu_dtype),           # (N, D, 3hq)
        bqkv=jnp.stack(bqkv),                             # (N, 1, 3hq) f32
        wo=jnp.stack(wo).astype(mxu_dtype),               # (N, hq, D)
        wff=jnp.stack(wff).astype(mxu_dtype),             # (N, 2, D, D)
        encv=jnp.stack(encv),                             # (N, 7, 1, D) f32
    )


# ----------------------------------------------------------------------------
if __name__ == "__main__":
    d_model, d_hidden, d_static = 32, 16, 8
    max_code, d_output = 20, 3
    q_dim, v_dim, h_heads, n_layers = 8, 8, 2, 2
    B, L = 2, 8

    root = jax.random.PRNGKey(0)
    kx, kc, kt, ks, kp = jax.random.split(root, 5)
    times = jnp.sort(jax.random.uniform(kt, (B, L), jnp.float32), axis=1)
    codes = jax.random.randint(kc, (B, L), 0, max_code + 1).astype(jnp.float32)
    vals = jax.random.normal(kx, (B, L), jnp.float32)
    x = jnp.stack([times, codes, vals], axis=-1)          # (B, L, 3)
    static = jax.random.normal(ks, (B, d_static), jnp.float32)

    raw = init_params(kp, d_model, d_hidden, d_static, max_code, d_output,
                      q_dim, h_heads, n_layers)
    packed = pack_params(raw, d_model=d_model, q=q_dim, h=h_heads,
                         d_output=d_output)

    out = apricott_forward(x, static, packed,
                           d_model=d_model, q=q_dim, h=h_heads,
                           n_layers=n_layers, d_output=d_output)
    out = jax.block_until_ready(out)
    assert out.shape == (B, d_output), out.shape
    assert bool(jnp.all(jnp.isfinite(out)))
    print("KERNEL_OK")
</pallas_src>

<mosaic_0001>
module attributes {stable_mosaic.version = 11 : i64} {
  func.func @kernel(%arg0: i32, %arg1: i32, %arg2: memref<1x8x1xf32, #tpu.memory_space<vmem>>, %arg3: memref<1x8x1xf32, #tpu.memory_space<vmem>>, %arg4: memref<1x8x32xf32, #tpu.memory_space<vmem>>, %arg5: memref<1x1x8xf32, #tpu.memory_space<vmem>>, %arg6: memref<1x1x8xf32, #tpu.memory_space<vmem>>, %arg7: memref<2x32xf32, #tpu.memory_space<vmem>>, %arg8: memref<2x16xf32, #tpu.memory_space<vmem>>, %arg9: memref<1x16xf32, #tpu.memory_space<vmem>>, %arg10: memref<16x32xbf16, #tpu.memory_space<vmem>>, %arg11: memref<1x32xf32, #tpu.memory_space<vmem>>, %arg12: memref<8x32xbf16, #tpu.memory_space<vmem>>, %arg13: memref<32x32xbf16, #tpu.memory_space<vmem>>, %arg14: memref<3x1x32xf32, #tpu.memory_space<vmem>>, %arg15: memref<160x32xbf16, #tpu.memory_space<vmem>>, %arg16: memref<32x128xbf16, #tpu.memory_space<vmem>>, %arg17: memref<1x128xf32, #tpu.memory_space<vmem>>, %arg18: memref<1x32x48xbf16, #tpu.memory_space<vmem>>, %arg19: memref<1x1x48xf32, #tpu.memory_space<vmem>>, %arg20: memref<1x16x32xbf16, #tpu.memory_space<vmem>>, %arg21: memref<1x2x32x32xbf16, #tpu.memory_space<vmem>>, %arg22: memref<1x7x1x32xf32, #tpu.memory_space<vmem>>, %arg23: memref<1x1x128xf32, #tpu.memory_space<vmem>>, %arg24: memref<8x32xf32, #tpu.memory_space<vmem>>) attributes {dimension_semantics = [#tpu.dimension_semantics<parallel>, #tpu.dimension_semantics<arbitrary>], iteration_bounds = array<i64: 2, 2>, scalar_prefetch = 0 : i64, scratch_operands = 1 : i64, tpu.core_type = #tpu.core_type<tc>, window_params = [{transform_indices = @transform_0, window_bounds = array<i64: 1, 8, 1>}, {transform_indices = @transform_1, window_bounds = array<i64: 1, 8, 1>}, {transform_indices = @transform_2, window_bounds = array<i64: 1, 8, 32>}, {transform_indices = @transform_3, window_bounds = array<i64: 1, 1, 8>}, {transform_indices = @transform_4, window_bounds = array<i64: 1, 1, 8>}, {pipeline_mode = #tpu.pipeline_mode<synchronous>, transform_indices = @transform_5, window_bounds = array<i64: 2, 32>}, {pipeline_mode = #tpu.pipeline_mode<synchronous>, transform_indices = @transform_6, window_bounds = array<i64: 2, 16>}, {pipeline_mode = #tpu.pipeline_mode<synchronous>, transform_indices = @transform_7, window_bounds = array<i64: 1, 16>}, {pipeline_mode = #tpu.pipeline_mode<synchronous>, transform_indices = @transform_8, window_bounds = array<i64: 16, 32>}, {pipeline_mode = #tpu.pipeline_mode<synchronous>, transform_indices = @transform_9, window_bounds = array<i64: 1, 32>}, {pipeline_mode = #tpu.pipeline_mode<synchronous>, transform_indices = @transform_10, window_bounds = array<i64: 8, 32>}, {pipeline_mode = #tpu.pipeline_mode<synchronous>, transform_indices = @transform_11, window_bounds = array<i64: 32, 32>}, {pipeline_mode = #tpu.pipeline_mode<synchronous>, transform_indices = @transform_12, window_bounds = array<i64: 3, 1, 32>}, {pipeline_mode = #tpu.pipeline_mode<synchronous>, transform_indices = @transform_13, window_bounds = array<i64: 160, 32>}, {pipeline_mode = #tpu.pipeline_mode<synchronous>, transform_indices = @transform_14, window_bounds = array<i64: 32, 128>}, {pipeline_mode = #tpu.pipeline_mode<synchronous>, transform_indices = @transform_15, window_bounds = array<i64: 1, 128>}, {transform_indices = @transform_16, window_bounds = array<i64: 1, 32, 48>}, {transform_indices = @transform_17, window_bounds = array<i64: 1, 1, 48>}, {transform_indices = @transform_18, window_bounds = array<i64: 1, 16, 32>}, {transform_indices = @transform_19, window_bounds = array<i64: 1, 2, 32, 32>}, {transform_indices = @transform_20, window_bounds = array<i64: 1, 7, 1, 32>}, {transform_indices = @transform_21, window_bounds = array<i64: 1, 1, 128>}]} {
    %c0_i32 = arith.constant 0 : i32
    %0 = arith.cmpi eq, %arg1, %c0_i32 : i32
    %1 = arith.extui %0 : i1 to i32
    %c0_i32_0 = arith.constant 0 : i32
    %2 = arith.cmpi ne, %1, %c0_i32_0 : i32
    scf.if %2 {
      %c0_71 = arith.constant 0 : index
      %c0_72 = arith.constant 0 : index
      %c0_73 = arith.constant 0 : index
      %141 = vector.load %arg2[%c0_71, %c0_72, %c0_73] : memref<1x8x1xf32, #tpu.memory_space<vmem>>, vector<1x8x1xf32>
      %142 = vector.shape_cast %141 : vector<1x8x1xf32> to vector<8x1xf32>
      %c0_74 = arith.constant 0 : index
      %c0_75 = arith.constant 0 : index
      %c0_76 = arith.constant 0 : index
      %143 = vector.load %arg3[%c0_74, %c0_75, %c0_76] : memref<1x8x1xf32, #tpu.memory_space<vmem>>, vector<1x8x1xf32>
      %144 = vector.shape_cast %143 : vector<1x8x1xf32> to vector<8x1xf32>
      %c0_77 = arith.constant 0 : index
      %c0_78 = arith.constant 0 : index
      %145 = vector.load %arg8[%c0_77, %c0_78] : memref<2x16xf32, #tpu.memory_space<vmem>>, vector<2x16xf32>
      %146 = vector.extract_strided_slice %145 {offsets = [0, 0], sizes = [1, 16], strides = [1, 1]} : vector<2x16xf32> to vector<1x16xf32>
      %147 = vector.broadcast %142 : vector<8x1xf32> to vector<8x16xf32>
      %148 = vector.broadcast %146 : vector<1x16xf32> to vector<8x16xf32>
      %149 = arith.mulf %147, %148 : vector<8x16xf32>
      %150 = vector.extract_strided_slice %145 {offsets = [1, 0], sizes = [1, 16], strides = [1, 1]} : vector<2x16xf32> to vector<1x16xf32>
      %151 = vector.broadcast %144 : vector<8x1xf32> to vector<8x16xf32>
      %152 = vector.broadcast %150 : vector<1x16xf32> to vector<8x16xf32>
      %153 = arith.mulf %151, %152 : vector<8x16xf32>
      %154 = arith.addf %149, %153 : vector<8x16xf32>
      %c0_79 = arith.constant 0 : index
      %c0_80 = arith.constant 0 : index
      %155 = vector.load %arg9[%c0_79, %c0_80] : memref<1x16xf32, #tpu.memory_space<vmem>>, vector<1x16xf32>
      %156 = vector.broadcast %155 : vector<1x16xf32> to vector<8x16xf32>
      %157 = arith.addf %154, %156 : vector<8x16xf32>
      %cst_81 = arith.constant 0.000000e+00 : f32
      %158 = vector.broadcast %cst_81 : f32 to vector<8x16xf32>
      %159 = arith.maximumf %157, %158 : vector<8x16xf32>
      %160 = arith.truncf %159 : vector<8x16xf32> to vector<8x16xbf16>
      %c0_82 = arith.constant 0 : index
      %c0_83 = arith.constant 0 : index
      %161 = vector.load %arg10[%c0_82, %c0_83] : memref<16x32xbf16, #tpu.memory_space<vmem>>, vector<16x32xbf16>
      %cst_84 = arith.constant dense<0.000000e+00> : vector<8x32xf32>
      %162 = tpu.matmul %160, %161, %cst_84 {dimension_numbers = #tpu.dot_dimension_numbers<[1], [0], [0], [1], [0, 0, 1, 1], [], []>} : vector<8x16xbf16>, vector<16x32xbf16>, vector<8x32xf32> -> vector<8x32xf32>
      %c0_85 = arith.constant 0 : index
      %c0_86 = arith.constant 0 : index
      %163 = vector.load %arg11[%c0_85, %c0_86] : memref<1x32xf32, #tpu.memory_space<vmem>>, vector<1x32xf32>
      %164 = vector.broadcast %163 : vector<1x32xf32> to vector<8x32xf32>
      %165 = arith.addf %162, %164 : vector<8x32xf32>
      %c0_87 = arith.constant 0 : index
      %c0_88 = arith.constant 0 : index
      %166 = vector.load %arg7[%c0_87, %c0_88] : memref<2x32xf32, #tpu.memory_space<vmem>>, vector<1x32xf32>
      %c1_89 = arith.constant 1 : index
      %c0_90 = arith.constant 0 : index
      %167 = vector.load %arg7[%c1_89, %c0_90] : memref<2x32xf32, #tpu.memory_space<vmem>>, vector<1x32xf32>
      %168 = vector.broadcast %142 : vector<8x1xf32> to vector<8x32xf32>
      %169 = vector.broadcast %166 : vector<1x32xf32> to vector<8x32xf32>
      %170 = arith.mulf %168, %169 : vector<8x32xf32>
      %171 = math.sin %170 : vector<8x32xf32>
      %172 = vector.broadcast %167 : vector<1x32xf32> to vector<8x32xf32>
      %173 = arith.mulf %172, %171 : vector<8x32xf32>
      %cst_91 = arith.constant 1.000000e+00 : f32
      %174 = vector.broadcast %cst_91 : f32 to vector<1x32xf32>
      %175 = arith.subf %174, %167 : vector<1x32xf32>
      %176 = math.cos %170 : vector<8x32xf32>
      %177 = vector.broadcast %175 : vector<1x32xf32> to vector<8x32xf32>
      %178 = arith.mulf %177, %176 : vector<8x32xf32>
      %179 = arith.addf %173, %178 : vector<8x32xf32>
      %c0_92 = arith.constant 0 : index
      %c0_93 = arith.constant 0 : index
      %c0_94 = arith.constant 0 : index
      %180 = vector.load %arg4[%c0_92, %c0_93, %c0_94] : memref<1x8x32xf32, #tpu.memory_space<vmem>>, vector<1x8x32xf32>
      %181 = vector.shape_cast %180 : vector<1x8x32xf32> to vector<8x32xf32>
      %182 = arith.addf %165, %181 : vector<8x32xf32>
      %183 = arith.addf %182, %179 : vector<8x32xf32>
      %c0_95 = arith.constant 0 : index
      %c0_96 = arith.constant 0 : index
      %184 = vector.load %arg24[%c0_95, %c0_96] : memref<8x32xf32, #tpu.memory_space<vmem>>, vector<8x32xf32>
      tpu.vector_store %arg24[%c0_95, %c0_96], %183 {strides = array<i32>} : memref<8x32xf32, #tpu.memory_space<vmem>>, vector<8x32xf32>,
    } else {
    }
    %c0 = arith.constant 0 : index
    %c0_1 = arith.constant 0 : index
    %c0_2 = arith.constant 0 : index
    %3 = vector.load %arg5[%c0, %c0_1, %c0_2] : memref<1x1x8xf32, #tpu.memory_space<vmem>>, vector<1x1x8xf32>
    %cst = arith.constant 1.000000e+00 : f32
    %4 = vector.broadcast %cst : f32 to vector<1x1x8xf32>
    %5 = arith.subf %3, %4 : vector<1x1x8xf32>
    %cst_3 = arith.constant 1.000000e+30 : f32
    %6 = vector.broadcast %cst_3 : f32 to vector<1x1x8xf32>
    %7 = arith.mulf %5, %6 : vector<1x1x8xf32>
    %c0_4 = arith.constant 0 : index
    %c0_5 = arith.constant 0 : index
    %8 = vector.load %arg24[%c0_4, %c0_5] : memref<8x32xf32, #tpu.memory_space<vmem>>, vector<8x32xf32>
    %9 = arith.truncf %8 : vector<8x32xf32> to vector<8x32xbf16>
    %c0_6 = arith.constant 0 : index
    %c0_7 = arith.constant 0 : index
    %c0_8 = arith.constant 0 : index
    %10 = vector.load %arg18[%c0_6, %c0_7, %c0_8] : memref<1x32x48xbf16, #tpu.memory_space<vmem>>, vector<1x32x48xbf16>
    %11 = vector.shape_cast %10 : vector<1x32x48xbf16> to vector<32x48xbf16>
    %cst_9 = arith.constant dense<0.000000e+00> : vector<8x48xf32>
    %12 = tpu.matmul %9, %11, %cst_9 {dimension_numbers = #tpu.dot_dimension_numbers<[1], [0], [0], [1], [0, 0, 1, 1], [], []>} : vector<8x32xbf16>, vector<32x48xbf16>, vector<8x48xf32> -> vector<8x48xf32>
    %c0_10 = arith.constant 0 : index
    %c0_11 = arith.constant 0 : index
    %c0_12 = arith.constant 0 : index
    %13 = vector.load %arg19[%c0_10, %c0_11, %c0_12] : memref<1x1x48xf32, #tpu.memory_space<vmem>>, vector<1x1x48xf32>
    %14 = vector.shape_cast %13 : vector<1x1x48xf32> to vector<1x48xf32>
    %15 = vector.broadcast %14 : vector<1x48xf32> to vector<8x48xf32>
    %16 = arith.addf %12, %15 : vector<8x48xf32>
    %17 = arith.truncf %16 : vector<8x48xf32> to vector<8x48xbf16>
    %18 = vector.shape_cast %17 : vector<8x48xbf16> to vector<1x8x48xbf16>
    %19 = vector.extract_strided_slice %18 {offsets = [0, 0, 0], sizes = [1, 8, 8], strides = [1, 1, 1]} : vector<1x8x48xbf16> to vector<1x8x8xbf16>
    %20 = vector.extract_strided_slice %18 {offsets = [0, 0, 16], sizes = [1, 8, 8], strides = [1, 1, 1]} : vector<1x8x48xbf16> to vector<1x8x8xbf16>
    %21 = vector.extract_strided_slice %18 {offsets = [0, 0, 32], sizes = [1, 8, 8], strides = [1, 1, 1]} : vector<1x8x48xbf16> to vector<1x8x8xbf16>
    "tpu.trace_start"() <{level = 10 : i32, message = "blq,bmq->blm"}> : () -> ()
    %cst_13 = arith.constant dense<0.000000e+00> : vector<1x8x8xf32>
    %22 = tpu.matmul %19, %20, %cst_13 {dimension_numbers = #tpu.dot_dimension_numbers<[2], [2], [1], [1], [0, 0, 0, 1, 1, 1], [0], [0]>} : vector<1x8x8xbf16>, vector<1x8x8xbf16>, vector<1x8x8xf32> -> vector<1x8x8xf32>
    "tpu.trace_stop"() : () -> ()
    %23 = vector.broadcast %7 : vector<1x1x8xf32> to vector<1x8x8xf32>
    %24 = arith.addf %22, %23 : vector<1x8x8xf32>
    %cst_14 = arith.constant dense<0xFF800000> : vector<1x8xf32>
    %25 = vector.multi_reduction <maximumf>, %24, %cst_14 [2] : vector<1x8x8xf32> to vector<1x8xf32>
    %26 = vector.shape_cast %25 : vector<1x8xf32> to vector<1x8x1xf32>
    %27 = vector.broadcast %26 : vector<1x8x1xf32> to vector<1x8x8xf32>
    %28 = arith.subf %24, %27 : vector<1x8x8xf32>
    %29 = math.exp %28 : vector<1x8x8xf32>
    %cst_15 = arith.constant dense<0.000000e+00> : vector<1x8xf32>
    %30 = vector.multi_reduction <add>, %29, %cst_15 [2] : vector<1x8x8xf32> to vector<1x8xf32>
    %31 = vector.shape_cast %30 : vector<1x8xf32> to vector<1x8x1xf32>
    %32 = tpu.reciprocal %31 {approx = true} : vector<1x8x1xf32> -> vector<1x8x1xf32>
    %33 = vector.broadcast %32 : vector<1x8x1xf32> to vector<1x8x8xf32>
    %34 = arith.mulf %29, %33 : vector<1x8x8xf32>
    %35 = arith.truncf %34 : vector<1x8x8xf32> to vector<1x8x8xbf16>
    "tpu.trace_start"() <{level = 10 : i32, message = "blm,bmq->blq"}> : () -> ()
    %cst_16 = arith.constant dense<0.000000e+00> : vector<1x8x8xf32>
    %36 = tpu.matmul %35, %21, %cst_16 {dimension_numbers = #tpu.dot_dimension_numbers<[2], [1], [1], [2], [0, 0, 0, 1, 1, 2], [0], [0]>} : vector<1x8x8xbf16>, vector<1x8x8xbf16>, vector<1x8x8xf32> -> vector<1x8x8xf32>
    "tpu.trace_stop"() : () -> ()
    %37 = vector.extract_strided_slice %18 {offsets = [0, 0, 8], sizes = [1, 8, 8], strides = [1, 1, 1]} : vector<1x8x48xbf16> to vector<1x8x8xbf16>
    %38 = vector.extract_strided_slice %18 {offsets = [0, 0, 24], sizes = [1, 8, 8], strides = [1, 1, 1]} : vector<1x8x48xbf16> to vector<1x8x8xbf16>
    %39 = vector.extract_strided_slice %18 {offsets = [0, 0, 40], sizes = [1, 8, 8], strides = [1, 1, 1]} : vector<1x8x48xbf16> to vector<1x8x8xbf16>
    "tpu.trace_start"() <{level = 10 : i32, message = "blq,bmq->blm"}> : () -> ()
    %cst_17 = arith.constant dense<0.000000e+00> : vector<1x8x8xf32>
    %40 = tpu.matmul %37, %38, %cst_17 {dimension_numbers = #tpu.dot_dimension_numbers<[2], [2], [1], [1], [0, 0, 0, 1, 1, 1], [0], [0]>} : vector<1x8x8xbf16>, vector<1x8x8xbf16>, vector<1x8x8xf32> -> vector<1x8x8xf32>
    "tpu.trace_stop"() : () -> ()
    %41 = vector.broadcast %7 : vector<1x1x8xf32> to vector<1x8x8xf32>
    %42 = arith.addf %40, %41 : vector<1x8x8xf32>
    %cst_18 = arith.constant dense<0xFF800000> : vector<1x8xf32>
    %43 = vector.multi_reduction <maximumf>, %42, %cst_18 [2] : vector<1x8x8xf32> to vector<1x8xf32>
    %44 = vector.shape_cast %43 : vector<1x8xf32> to vector<1x8x1xf32>
    %45 = vector.broadcast %44 : vector<1x8x1xf32> to vector<1x8x8xf32>
    %46 = arith.subf %42, %45 : vector<1x8x8xf32>
    %47 = math.exp %46 : vector<1x8x8xf32>
    %cst_19 = arith.constant dense<0.000000e+00> : vector<1x8xf32>
    %48 = vector.multi_reduction <add>, %47, %cst_19 [2] : vector<1x8x8xf32> to vector<1x8xf32>
    %49 = vector.shape_cast %48 : vector<1x8xf32> to vector<1x8x1xf32>
    %50 = tpu.reciprocal %49 {approx = true} : vector<1x8x1xf32> -> vector<1x8x1xf32>
    %51 = vector.broadcast %50 : vector<1x8x1xf32> to vector<1x8x8xf32>
    %52 = arith.mulf %47, %51 : vector<1x8x8xf32>
    %53 = arith.truncf %52 : vector<1x8x8xf32> to vector<1x8x8xbf16>
    "tpu.trace_start"() <{level = 10 : i32, message = "blm,bmq->blq"}> : () -> ()
    %cst_20 = arith.constant dense<0.000000e+00> : vector<1x8x8xf32>
    %54 = tpu.matmul %53, %39, %cst_20 {dimension_numbers = #tpu.dot_dimension_numbers<[2], [1], [1], [2], [0, 0, 0, 1, 1, 2], [0], [0]>} : vector<1x8x8xbf16>, vector<1x8x8xbf16>, vector<1x8x8xf32> -> vector<1x8x8xf32>
    "tpu.trace_stop"() : () -> ()
    %55 = tpu.concatenate %36, %54 in 2 : vector<1x8x8xf32>, vector<1x8x8xf32> -> vector<1x8x16xf32>
    %56 = arith.truncf %55 : vector<1x8x16xf32> to vector<1x8x16xbf16>
    %57 = vector.shape_cast %56 : vector<1x8x16xbf16> to vector<8x16xbf16>
    %c0_21 = arith.constant 0 : index
    %c0_22 = arith.constant 0 : index
    %c0_23 = arith.constant 0 : index
    %58 = vector.load %arg20[%c0_21, %c0_22, %c0_23] : memref<1x16x32xbf16, #tpu.memory_space<vmem>>, vector<1x16x32xbf16>
    %59 = vector.shape_cast %58 : vector<1x16x32xbf16> to vector<16x32xbf16>
    %cst_24 = arith.constant dense<0.000000e+00> : vector<8x32xf32>
    %60 = tpu.matmul %57, %59, %cst_24 {dimension_numbers = #tpu.dot_dimension_numbers<[1], [0], [0], [1], [0, 0, 1, 1], [], []>} : vector<8x16xbf16>, vector<16x32xbf16>, vector<8x32xf32> -> vector<8x32xf32>
    %c0_25 = arith.constant 0 : index
    %c0_26 = arith.constant 0 : index
    %c0_27 = arith.constant 0 : index
    %c0_28 = arith.constant 0 : index
    %61 = vector.load %arg22[%c0_25, %c0_26, %c0_27, %c0_28] : memref<1x7x1x32xf32, #tpu.memory_space<vmem>>, vector<1x1x1x32xf32>
    %62 = vector.shape_cast %61 : vector<1x1x1x32xf32> to vector<1x32xf32>
    %63 = vector.broadcast %62 : vector<1x32xf32> to vector<8x32xf32>
    %64 = arith.addf %60, %63 : vector<8x32xf32>
    %65 = arith.addf %64, %8 : vector<8x32xf32>
    %c0_29 = arith.constant 0 : index
    %c3 = arith.constant 3 : index
    %c0_30 = arith.constant 0 : index
    %c0_31 = arith.constant 0 : index
    %66 = vector.load %arg22[%c0_29, %c3, %c0_30, %c0_31] : memref<1x7x1x32xf32, #tpu.memory_space<vmem>>, vector<1x1x1x32xf32>
    %67 = vector.shape_cast %66 : vector<1x1x1x32xf32> to vector<1x32xf32>
    %c0_32 = arith.constant 0 : index
    %c4 = arith.constant 4 : index
    %c0_33 = arith.constant 0 : index
    %c0_34 = arith.constant 0 : index
    %68 = vector.load %arg22[%c0_32, %c4, %c0_33, %c0_34] : memref<1x7x1x32xf32, #tpu.memory_space<vmem>>, vector<1x1x1x32xf32>
    %69 = vector.shape_cast %68 : vector<1x1x1x32xf32> to vector<1x32xf32>
    %cst_35 = arith.constant dense<0.000000e+00> : vector<8xf32>
    %70 = vector.multi_reduction <add>, %65, %cst_35 [1] : vector<8x32xf32> to vector<8xf32>
    %71 = vector.shape_cast %70 : vector<8xf32> to vector<8x1xf32>
    %cst_36 = arith.constant 3.200000e+01 : f32
    %72 = vector.broadcast %cst_36 : f32 to vector<8x1xf32>
    %73 = arith.divf %71, %72 : vector<8x1xf32>
    %74 = vector.broadcast %73 : vector<8x1xf32> to vector<8x32xf32>
    %75 = arith.subf %65, %74 : vector<8x32xf32>
    %76 = arith.mulf %75, %75 : vector<8x32xf32>
    %cst_37 = arith.constant dense<0.000000e+00> : vector<8xf32>
    %77 = vector.multi_reduction <add>, %76, %cst_37 [1] : vector<8x32xf32> to vector<8xf32>
    %78 = vector.shape_cast %77 : vector<8xf32> to vector<8x1xf32>
    %cst_38 = arith.constant 3.200000e+01 : f32
    %79 = vector.broadcast %cst_38 : f32 to vector<8x1xf32>
    %80 = arith.divf %78, %79 : vector<8x1xf32>
    %81 = vector.broadcast %73 : vector<8x1xf32> to vector<8x32xf32>
    %82 = arith.subf %65, %81 : vector<8x32xf32>
    %cst_39 = arith.constant 9.99999974E-6 : f32
    %83 = vector.broadcast %cst_39 : f32 to vector<8x1xf32>
    %84 = arith.addf %80, %83 : vector<8x1xf32>
    %85 = math.rsqrt %84 : vector<8x1xf32>
    %86 = vector.broadcast %85 : vector<8x1xf32> to vector<8x32xf32>
    %87 = arith.mulf %82, %86 : vector<8x32xf32>
    %88 = vector.broadcast %67 : vector<1x32xf32> to vector<8x32xf32>
    %89 = arith.mulf %87, %88 : vector<8x32xf32>
    %90 = vector.broadcast %69 : vector<1x32xf32> to vector<8x32xf32>
    %91 = arith.addf %89, %90 : vector<8x32xf32>
    %92 = arith.truncf %91 : vector<8x32xf32> to vector<8x32xbf16>
    %c0_40 = arith.constant 0 : index
    %c0_41 = arith.constant 0 : index
    %c0_42 = arith.constant 0 : index
    %c0_43 = arith.constant 0 : index
    %93 = vector.load %arg21[%c0_40, %c0_41, %c0_42, %c0_43] : memref<1x2x32x32xbf16, #tpu.memory_space<vmem>>, vector<1x1x32x32xbf16>
    %94 = vector.shape_cast %93 : vector<1x1x32x32xbf16> to vector<32x32xbf16>
    %cst_44 = arith.constant dense<0.000000e+00> : vector<8x32xf32>
    %95 = tpu.matmul %92, %94, %cst_44 {dimension_numbers = #tpu.dot_dimension_numbers<[1], [0], [0], [1], [0, 0, 1, 1], [], []>} : vector<8x32xbf16>, vector<32x32xbf16>, vector<8x32xf32> -> vector<8x32xf32>
    %c0_45 = arith.constant 0 : index
    %c1 = arith.constant 1 : index
    %c0_46 = arith.constant 0 : index
    %c0_47 = arith.constant 0 : index
    %96 = vector.load %arg22[%c0_45, %c1, %c0_46, %c0_47] : memref<1x7x1x32xf32, #tpu.memory_space<vmem>>, vector<1x1x1x32xf32>
    %97 = vector.shape_cast %96 : vector<1x1x1x32xf32> to vector<1x32xf32>
    %98 = vector.broadcast %97 : vector<1x32xf32> to vector<8x32xf32>
    %99 = arith.addf %95, %98 : vector<8x32xf32>
    %cst_48 = arith.constant 0.000000e+00 : f32
    %100 = vector.broadcast %cst_48 : f32 to vector<8x32xf32>
    %101 = arith.maximumf %99, %100 : vector<8x32xf32>
    %102 = arith.truncf %101 : vector<8x32xf32> to vector<8x32xbf16>
    %c0_49 = arith.constant 0 : index
    %c1_50 = arith.constant 1 : index
    %c0_51 = arith.constant 0 : index
    %c0_52 = arith.constant 0 : index
    %103 = vector.load %arg21[%c0_49, %c1_50, %c0_51, %c0_52] : memref<1x2x32x32xbf16, #tpu.memory_space<vmem>>, vector<1x1x32x32xbf16>
    %104 = vector.shape_cast %103 : vector<1x1x32x32xbf16> to vector<32x32xbf16>
    %cst_53 = arith.constant dense<0.000000e+00> : vector<8x32xf32>
    %105 = tpu.matmul %102, %104, %cst_53 {dimension_numbers = #tpu.dot_dimension_numbers<[1], [0], [0], [1], [0, 0, 1, 1], [], []>} : vector<8x32xbf16>, vector<32x32xbf16>, vector<8x32xf32> -> vector<8x32xf32>
    %c0_54 = arith.constant 0 : index
    %c2 = arith.constant 2 : index
    %c0_55 = arith.constant 0 : index
    %c0_56 = arith.constant 0 : index
    %106 = vector.load %arg22[%c0_54, %c2, %c0_55, %c0_56] : memref<1x7x1x32xf32, #tpu.memory_space<vmem>>, vector<1x1x1x32xf32>
    %107 = vector.shape_cast %106 : vector<1x1x1x32xf32> to vector<1x32xf32>
    %108 = vector.broadcast %107 : vector<1x32xf32> to vector<8x32xf32>
    %109 = arith.addf %105, %108 : vector<8x32xf32>
    %110 = arith.addf %109, %91 : vector<8x32xf32>
    %c0_57 = arith.constant 0 : index
    %c5 = arith.constant 5 : index
    %c0_58 = arith.constant 0 : index
    %c0_59 = arith.constant 0 : index
    %111 = vector.load %arg22[%c0_57, %c5, %c0_58, %c0_59] : memref<1x7x1x32xf32, #tpu.memory_space<vmem>>, vector<1x1x1x32xf32>
    %112 = vector.shape_cast %111 : vector<1x1x1x32xf32> to vector<1x32xf32>
    %c0_60 = arith.constant 0 : index
    %c6 = arith.constant 6 : index
    %c0_61 = arith.constant 0 : index
    %c0_62 = arith.constant 0 : index
    %113 = vector.load %arg22[%c0_60, %c6, %c0_61, %c0_62] : memref<1x7x1x32xf32, #tpu.memory_space<vmem>>, vector<1x1x1x32xf32>
    %114 = vector.shape_cast %113 : vector<1x1x1x32xf32> to vector<1x32xf32>
    %cst_63 = arith.constant dense<0.000000e+00> : vector<8xf32>
    %115 = vector.multi_reduction <add>, %110, %cst_63 [1] : vector<8x32xf32> to vector<8xf32>
    %116 = vector.shape_cast %115 : vector<8xf32> to vector<8x1xf32>
    %cst_64 = arith.constant 3.200000e+01 : f32
    %117 = vector.broadcast %cst_64 : f32 to vector<8x1xf32>
    %118 = arith.divf %116, %117 : vector<8x1xf32>
    %119 = vector.broadcast %118 : vector<8x1xf32> to vector<8x32xf32>
    %120 = arith.subf %110, %119 : vector<8x32xf32>
    %121 = arith.mulf %120, %120 : vector<8x32xf32>
    %cst_65 = arith.constant dense<0.000000e+00> : vector<8xf32>
    %122 = vector.multi_reduction <add>, %121, %cst_65 [1] : vector<8x32xf32> to vector<8xf32>
    %123 = vector.shape_cast %122 : vector<8xf32> to vector<8x1xf32>
    %cst_66 = arith.constant 3.200000e+01 : f32
    %124 = vector.broadcast %cst_66 : f32 to vector<8x1xf32>
    %125 = arith.divf %123, %124 : vector<8x1xf32>
    %126 = vector.broadcast %118 : vector<8x1xf32> to vector<8x32xf32>
    %127 = arith.subf %110, %126 : vector<8x32xf32>
    %cst_67 = arith.constant 9.99999974E-6 : f32
    %128 = vector.broadcast %cst_67 : f32 to vector<8x1xf32>
    %129 = arith.addf %125, %128 : vector<8x1xf32>
    %130 = math.rsqrt %129 : vector<8x1xf32>
    %131 = vector.broadcast %130 : vector<8x1xf32> to vector<8x32xf32>
    %132 = arith.mulf %127, %131 : vector<8x32xf32>
    %133 = vector.broadcast %112 : vector<1x32xf32> to vector<8x32xf32>
    %134 = arith.mulf %132, %133 : vector<8x32xf32>
    %135 = vector.broadcast %114 : vector<1x32xf32> to vector<8x32xf32>
    %136 = arith.addf %134, %135 : vector<8x32xf32>
    %c0_68 = arith.constant 0 : index
    %c0_69 = arith.constant 0 : index
    %137 = vector.load %arg24[%c0_68, %c0_69] : memref<8x32xf32, #tpu.memory_space<vmem>>, vector<8x32xf32>
    tpu.vector_store %arg24[%c0_68, %c0_69], %136 {strides = array<i32>} : memref<8x32xf32, #tpu.memory_space<vmem>>, vector<8x32xf32>,
    %c1_i32 = arith.constant 1 : i32
    %138 = arith.cmpi eq, %arg1, %c1_i32 : i32
    %139 = arith.extui %138 : i1 to i32
    %c0_i32_70 = arith.constant 0 : i32
    %140 = arith.cmpi ne, %139, %c0_i32_70 : i32
    scf.if %140 {
      %c0_71 = arith.constant 0 : index
      %c0_72 = arith.constant 0 : index
      %c0_73 = arith.constant 0 : index
      %141 = vector.load %arg6[%c0_71, %c0_72, %c0_73] : memref<1x1x8xf32, #tpu.memory_space<vmem>>, vector<1x1x8xf32>
      %142 = vector.shape_cast %141 : vector<1x1x8xf32> to vector<1x8xf32>
      %143 = arith.truncf %142 : vector<1x8xf32> to vector<1x8xbf16>
      %c0_74 = arith.constant 0 : index
      %c0_75 = arith.constant 0 : index
      %144 = vector.load %arg12[%c0_74, %c0_75] : memref<8x32xbf16, #tpu.memory_space<vmem>>, vector<8x32xbf16>
      %cst_76 = arith.constant dense<0.000000e+00> : vector<1x32xf32>
      %145 = tpu.matmul %143, %144, %cst_76 {dimension_numbers = #tpu.dot_dimension_numbers<[1], [0], [0], [1], [0, 0, 1, 1], [], []>} : vector<1x8xbf16>, vector<8x32xbf16>, vector<1x32xf32> -> vector<1x32xf32>
      %c0_77 = arith.constant 0 : index
      %c0_78 = arith.constant 0 : index
      %c0_79 = arith.constant 0 : index
      %146 = vector.load %arg14[%c0_77, %c0_78, %c0_79] : memref<3x1x32xf32, #tpu.memory_space<vmem>>, vector<1x1x32xf32>
      %147 = vector.shape_cast %146 : vector<1x1x32xf32> to vector<1x32xf32>
      %148 = arith.addf %145, %147 : vector<1x32xf32>
      %cst_80 = arith.constant 0.000000e+00 : f32
      %149 = vector.broadcast %cst_80 : f32 to vector<1x32xf32>
      %150 = arith.maximumf %148, %149 : vector<1x32xf32>
      %151 = arith.truncf %150 : vector<1x32xf32> to vector<1x32xbf16>
      %c0_81 = arith.constant 0 : index
      %c0_82 = arith.constant 0 : index
      %152 = vector.load %arg13[%c0_81, %c0_82] : memref<32x32xbf16, #tpu.memory_space<vmem>>, vector<32x32xbf16>
      %cst_83 = arith.constant dense<0.000000e+00> : vector<1x32xf32>
      %153 = tpu.matmul %151, %152, %cst_83 {dimension_numbers = #tpu.dot_dimension_numbers<[1], [0], [0], [1], [0, 0, 1, 1], [], []>} : vector<1x32xbf16>, vector<32x32xbf16>, vector<1x32xf32> -> vector<1x32xf32>
      %c1_84 = arith.constant 1 : index
      %c0_85 = arith.constant 0 : index
      %c0_86 = arith.constant 0 : index
      %154 = vector.load %arg14[%c1_84, %c0_85, %c0_86] : memref<3x1x32xf32, #tpu.memory_space<vmem>>, vector<1x1x32xf32>
      %155 = vector.shape_cast %154 : vector<1x1x32xf32> to vector<1x32xf32>
      %156 = arith.addf %153, %155 : vector<1x32xf32>
      %157 = vector.shape_cast %136 : vector<8x32xf32> to vector<1x8x32xf32>
      %158 = tpu.iota {dimensions = array<i32: 1>} : vector<1x8x32xi32>
      %cst_87 = arith.constant dense<0xFF800000> : vector<1x32xf32>
      %159 = vector.multi_reduction <maximumf>, %157, %cst_87 [1] : vector<1x8x32xf32> to vector<1x32xf32>
      %160 = vector.shape_cast %159 : vector<1x32xf32> to vector<1x1x32xf32>
      %161 = vector.broadcast %160 : vector<1x1x32xf32> to vector<1x8x32xf32>
      %162 = arith.cmpf oeq, %157, %161 : vector<1x8x32xf32>
      %c8_i32 = arith.constant 8 : i32
      %163 = vector.broadcast %c8_i32 : i32 to vector<1x8x32xi32>
      %164 = arith.select %162, %158, %163 : vector<1x8x32xi1>, vector<1x8x32xi32>
      %cst_88 = arith.constant dense<2147483647> : vector<1x32xi32>
      %165 = vector.multi_reduction <minsi>, %164, %cst_88 [1] : vector<1x8x32xi32> to vector<1x32xi32>
      %166 = vector.shape_cast %165 : vector<1x32xi32> to vector<1x1x32xi32>
      %167 = vector.broadcast %166 : vector<1x1x32xi32> to vector<1x8x32xi32>
      %168 = arith.cmpi eq, %158, %167 : vector<1x8x32xi32>
      %cst_89 = arith.constant 0xFF800000 : f32
      %169 = vector.broadcast %cst_89 : f32 to vector<1x8x32xf32>
      %170 = arith.select %168, %169, %157 : vector<1x8x32xi1>, vector<1x8x32xf32>
      %cst_90 = arith.constant dense<0xFF800000> : vector<1x32xf32>
      %171 = vector.multi_reduction <maximumf>, %170, %cst_90 [1] : vector<1x8x32xf32> to vector<1x32xf32>
      %172 = vector.shape_cast %171 : vector<1x32xf32> to vector<1x1x32xf32>
      %173 = vector.broadcast %172 : vector<1x1x32xf32> to vector<1x8x32xf32>
      %174 = arith.cmpf oeq, %170, %173 : vector<1x8x32xf32>
      %c8_i32_91 = arith.constant 8 : i32
      %175 = vector.broadcast %c8_i32_91 : i32 to vector<1x8x32xi32>
      %176 = arith.select %174, %158, %175 : vector<1x8x32xi1>, vector<1x8x32xi32>
      %cst_92 = arith.constant dense<2147483647> : vector<1x32xi32>
      %177 = vector.multi_reduction <minsi>, %176, %cst_92 [1] : vector<1x8x32xi32> to vector<1x32xi32>
      %178 = vector.shape_cast %177 : vector<1x32xi32> to vector<1x1x32xi32>
      %179 = vector.broadcast %178 : vector<1x1x32xi32> to vector<1x8x32xi32>
      %180 = arith.cmpi eq, %158, %179 : vector<1x8x32xi32>
      %cst_93 = arith.constant 0xFF800000 : f32
      %181 = vector.broadcast %cst_93 : f32 to vector<1x8x32xf32>
      %182 = arith.select %180, %181, %170 : vector<1x8x32xi1>, vector<1x8x32xf32>
      %cst_94 = arith.constant dense<0xFF800000> : vector<1x32xf32>
      %183 = vector.multi_reduction <maximumf>, %182, %cst_94 [1] : vector<1x8x32xf32> to vector<1x32xf32>
      %184 = vector.shape_cast %183 : vector<1x32xf32> to vector<1x1x32xf32>
      %185 = vector.broadcast %184 : vector<1x1x32xf32> to vector<1x8x32xf32>
      %186 = arith.cmpf oeq, %182, %185 : vector<1x8x32xf32>
      %c8_i32_95 = arith.constant 8 : i32
      %187 = vector.broadcast %c8_i32_95 : i32 to vector<1x8x32xi32>
      %188 = arith.select %186, %158, %187 : vector<1x8x32xi1>, vector<1x8x32xi32>
      %cst_96 = arith.constant dense<2147483647> : vector<1x32xi32>
      %189 = vector.multi_reduction <minsi>, %188, %cst_96 [1] : vector<1x8x32xi32> to vector<1x32xi32>
      %190 = vector.shape_cast %189 : vector<1x32xi32> to vector<1x1x32xi32>
      %191 = vector.broadcast %190 : vector<1x1x32xi32> to vector<1x8x32xi32>
      %192 = arith.cmpi eq, %158, %191 : vector<1x8x32xi32>
      %cst_97 = arith.constant 0xFF800000 : f32
      %193 = vector.broadcast %cst_97 : f32 to vector<1x8x32xf32>
      %194 = arith.select %192, %193, %182 : vector<1x8x32xi1>, vector<1x8x32xf32>
      %cst_98 = arith.constant dense<0xFF800000> : vector<1x32xf32>
      %195 = vector.multi_reduction <maximumf>, %194, %cst_98 [1] : vector<1x8x32xf32> to vector<1x32xf32>
      %196 = vector.shape_cast %195 : vector<1x32xf32> to vector<1x1x32xf32>
      %197 = vector.broadcast %196 : vector<1x1x32xf32> to vector<1x8x32xf32>
      %198 = arith.cmpf oeq, %194, %197 : vector<1x8x32xf32>
      %c8_i32_99 = arith.constant 8 : i32
      %199 = vector.broadcast %c8_i32_99 : i32 to vector<1x8x32xi32>
      %200 = arith.select %198, %158, %199 : vector<1x8x32xi1>, vector<1x8x32xi32>
      %cst_100 = arith.constant dense<2147483647> : vector<1x32xi32>
      %201 = vector.multi_reduction <minsi>, %200, %cst_100 [1] : vector<1x8x32xi32> to vector<1x32xi32>
      %202 = vector.shape_cast %201 : vector<1x32xi32> to vector<1x1x32xi32>
      %203 = vector.broadcast %202 : vector<1x1x32xi32> to vector<1x8x32xi32>
      %204 = arith.cmpi eq, %158, %203 : vector<1x8x32xi32>
      %cst_101 = arith.constant 0xFF800000 : f32
      %205 = vector.broadcast %cst_101 : f32 to vector<1x8x32xf32>
      %206 = arith.select %204, %205, %194 : vector<1x8x32xi1>, vector<1x8x32xf32>
      %cst_102 = arith.constant dense<0xFF800000> : vector<1x32xf32>
      %207 = vector.multi_reduction <maximumf>, %206, %cst_102 [1] : vector<1x8x32xf32> to vector<1x32xf32>
      %208 = tpu.concatenate %159, %171, %183, %195, %207 in 1 : vector<1x32xf32>, vector<1x32xf32>, vector<1x32xf32>, vector<1x32xf32>, vector<1x32xf32> -> vector<1x160xf32>
      %c2_103 = arith.constant 2 : index
      %c0_104 = arith.constant 0 : index
      %c0_105 = arith.constant 0 : index
      %209 = vector.load %arg14[%c2_103, %c0_104, %c0_105] : memref<3x1x32xf32, #tpu.memory_space<vmem>>, vector<1x1x32xf32>
      %210 = vector.shape_cast %209 : vector<1x1x32xf32> to vector<1x32xf32>
      %211 = arith.addf %156, %210 : vector<1x32xf32>
      %212 = arith.truncf %208 : vector<1x160xf32> to vector<1x160xbf16>
      %c0_106 = arith.constant 0 : index
      %c0_107 = arith.constant 0 : index
      %213 = vector.load %arg15[%c0_106, %c0_107] : memref<160x32xbf16, #tpu.memory_space<vmem>>, vector<160x32xbf16>
      %cst_108 = arith.constant dense<0.000000e+00> : vector<1x32xf32>
      %214 = tpu.matmul %212, %213, %cst_108 {dimension_numbers = #tpu.dot_dimension_numbers<[1], [0], [0], [1], [0, 0, 1, 1], [], []>} : vector<1x160xbf16>, vector<160x32xbf16>, vector<1x32xf32> -> vector<1x32xf32>
      %215 = arith.addf %211, %214 : vector<1x32xf32>
      %216 = arith.truncf %215 : vector<1x32xf32> to vector<1x32xbf16>
      %c0_109 = arith.constant 0 : index
      %c0_110 = arith.constant 0 : index
      %217 = vector.load %arg16[%c0_109, %c0_110] : memref<32x128xbf16, #tpu.memory_space<vmem>>, vector<32x128xbf16>
      %cst_111 = arith.constant dense<0.000000e+00> : vector<1x128xf32>
      %218 = tpu.matmul %216, %217, %cst_111 {dimension_numbers = #tpu.dot_dimension_numbers<[1], [0], [0], [1], [0, 0, 1, 1], [], []>} : vector<1x32xbf16>, vector<32x128xbf16>, vector<1x128xf32> -> vector<1x128xf32>
      %c0_112 = arith.constant 0 : index
      %c0_113 = arith.constant 0 : index
      %219 = vector.load %arg17[%c0_112, %c0_113] : memref<1x128xf32, #tpu.memory_space<vmem>>, vector<1x128xf32>
      %220 = arith.addf %218, %219 : vector<1x128xf32>
      %cst_114 = arith.constant 0.000000e+00 : f32
      %221 = vector.broadcast %cst_114 : f32 to vector<1x128xf32>
      %222 = arith.subf %221, %220 : vector<1x128xf32>
      %223 = math.exp %222 : vector<1x128xf32>
      %cst_115 = arith.constant 1.000000e+00 : f32
      %224 = vector.broadcast %cst_115 : f32 to vector<1x128xf32>
      %225 = arith.addf %224, %223 : vector<1x128xf32>
      %cst_116 = arith.constant 1.000000e+00 : f32
      %226 = vector.broadcast %cst_116 : f32 to vector<1x128xf32>
      %227 = arith.divf %226, %225 : vector<1x128xf32>
      %228 = vector.shape_cast %227 : vector<1x128xf32> to vector<1x1x128xf32>
      %c0_117 = arith.constant 0 : index
      %c0_118 = arith.constant 0 : index
      %c0_119 = arith.constant 0 : index
      %229 = vector.load %arg23[%c0_117, %c0_118, %c0_119] : memref<1x1x128xf32, #tpu.memory_space<vmem>>, vector<1x1x128xf32>
      tpu.vector_store %arg23[%c0_117, %c0_118, %c0_119], %228 {strides = array<i32>} : memref<1x1x128xf32, #tpu.memory_space<vmem>>, vector<1x1x128xf32>,
    } else {
    }
    return
  }
  func.func @transform_0(%arg0: i32, %arg1: i32) -> (i32, i32, i32) {
    %c0_i32 = arith.constant 0 : i32
    %c0_i32_0 = arith.constant 0 : i32
    %c0_i32_1 = arith.constant 0 : i32
    return %arg0, %c0_i32, %c0_i32_0 : i32, i32, i32
  }
  func.func @transform_1(%arg0: i32, %arg1: i32) -> (i32, i32, i32) {
    %c0_i32 = arith.constant 0 : i32
    %c0_i32_0 = arith.constant 0 : i32
    %c0_i32_1 = arith.constant 0 : i32
    return %arg0, %c0_i32, %c0_i32_0 : i32, i32, i32
  }
  func.func @transform_2(%arg0: i32, %arg1: i32) -> (i32, i32, i32) {
    %c0_i32 = arith.constant 0 : i32
    %c0_i32_0 = arith.constant 0 : i32
    %c0_i32_1 = arith.constant 0 : i32
    return %arg0, %c0_i32, %c0_i32_0 : i32, i32, i32
  }
  func.func @transform_3(%arg0: i32, %arg1: i32) -> (i32, i32, i32) {
    %c0_i32 = arith.constant 0 : i32
    %c0_i32_0 = arith.constant 0 : i32
    %c0_i32_1 = arith.constant 0 : i32
    return %arg0, %c0_i32, %c0_i32_0 : i32, i32, i32
  }
  func.func @transform_4(%arg0: i32, %arg1: i32) -> (i32, i32, i32) {
    %c0_i32 = arith.constant 0 : i32
    %c0_i32_0 = arith.constant 0 : i32
    %c0_i32_1 = arith.constant 0 : i32
    return %arg0, %c0_i32, %c0_i32_0 : i32, i32, i32
  }
  func.func @transform_5(%arg0: i32, %arg1: i32) -> (i32, i32) {
    %c0_i32 = arith.constant 0 : i32
    %c0_i32_0 = arith.constant 0 : i32
    %c0_i32_1 = arith.constant 0 : i32
    return %c0_i32, %c0_i32_0 : i32, i32
  }
  func.func @transform_6(%arg0: i32, %arg1: i32) -> (i32, i32) {
    %c0_i32 = arith.constant 0 : i32
    %c0_i32_0 = arith.constant 0 : i32
    %c0_i32_1 = arith.constant 0 : i32
    return %c0_i32, %c0_i32_0 : i32, i32
  }
  func.func @transform_7(%arg0: i32, %arg1: i32) -> (i32, i32) {
    %c0_i32 = arith.constant 0 : i32
    %c0_i32_0 = arith.constant 0 : i32
    %c0_i32_1 = arith.constant 0 : i32
    return %c0_i32, %c0_i32_0 : i32, i32
  }
  func.func @transform_8(%arg0: i32, %arg1: i32) -> (i32, i32) {
    %c0_i32 = arith.constant 0 : i32
    %c0_i32_0 = arith.constant 0 : i32
    %c0_i32_1 = arith.constant 0 : i32
    return %c0_i32, %c0_i32_0 : i32, i32
  }
  func.func @transform_9(%arg0: i32, %arg1: i32) -> (i32, i32) {
    %c0_i32 = arith.constant 0 : i32
    %c0_i32_0 = arith.constant 0 : i32
    %c0_i32_1 = arith.constant 0 : i32
    return %c0_i32, %c0_i32_0 : i32, i32
  }
  func.func @transform_10(%arg0: i32, %arg1: i32) -> (i32, i32) {
    %c0_i32 = arith.constant 0 : i32
    %c0_i32_0 = arith.constant 0 : i32
    %c0_i32_1 = arith.constant 0 : i32
    return %c0_i32, %c0_i32_0 : i32, i32
  }
  func.func @transform_11(%arg0: i32, %arg1: i32) -> (i32, i32) {
    %c0_i32 = arith.constant 0 : i32
    %c0_i32_0 = arith.constant 0 : i32
    %c0_i32_1 = arith.constant 0 : i32
    return %c0_i32, %c0_i32_0 : i32, i32
  }
  func.func @transform_12(%arg0: i32, %arg1: i32) -> (i32, i32, i32) {
    %c0_i32 = arith.constant 0 : i32
    %c0_i32_0 = arith.constant 0 : i32
    %c0_i32_1 = arith.constant 0 : i32
    %c0_i32_2 = arith.constant 0 : i32
    return %c0_i32, %c0_i32_0, %c0_i32_1 : i32, i32, i32
  }
  func.func @transform_13(%arg0: i32, %arg1: i32) -> (i32, i32) {
    %c0_i32 = arith.constant 0 : i32
    %c0_i32_0 = arith.constant 0 : i32
    %c0_i32_1 = arith.constant 0 : i32
    return %c0_i32, %c0_i32_0 : i32, i32
  }
  func.func @transform_14(%arg0: i32, %arg1: i32) -> (i32, i32) {
    %c0_i32 = arith.constant 0 : i32
    %c0_i32_0 = arith.constant 0 : i32
    %c0_i32_1 = arith.constant 0 : i32
    return %c0_i32, %c0_i32_0 : i32, i32
  }
  func.func @transform_15(%arg0: i32, %arg1: i32) -> (i32, i32) {
    %c0_i32 = arith.constant 0 : i32
    %c0_i32_0 = arith.constant 0 : i32
    %c0_i32_1 = arith.constant 0 : i32
    return %c0_i32, %c0_i32_0 : i32, i32
  }
  func.func @transform_16(%arg0: i32, %arg1: i32) -> (i32, i32, i32) {
    %c0_i32 = arith.constant 0 : i32
    %c0_i32_0 = arith.constant 0 : i32
    %c0_i32_1 = arith.constant 0 : i32
    return %arg1, %c0_i32, %c0_i32_0 : i32, i32, i32
  }
  func.func @transform_17(%arg0: i32, %arg1: i32) -> (i32, i32, i32) {
    %c0_i32 = arith.constant 0 : i32
    %c0_i32_0 = arith.constant 0 : i32
    %c0_i32_1 = arith.constant 0 : i32
    return %arg1, %c0_i32, %c0_i32_0 : i32, i32, i32
  }
  func.func @transform_18(%arg0: i32, %arg1: i32) -> (i32, i32, i32) {
    %c0_i32 = arith.constant 0 : i32
    %c0_i32_0 = arith.constant 0 : i32
    %c0_i32_1 = arith.constant 0 : i32
    return %arg1, %c0_i32, %c0_i32_0 : i32, i32, i32
  }
  func.func @transform_19(%arg0: i32, %arg1: i32) -> (i32, i32, i32, i32) {
    %c0_i32 = arith.constant 0 : i32
    %c0_i32_0 = arith.constant 0 : i32
    %c0_i32_1 = arith.constant 0 : i32
    %c0_i32_2 = arith.constant 0 : i32
    return %arg1, %c0_i32, %c0_i32_0, %c0_i32_1 : i32, i32, i32, i32
  }
  func.func @transform_20(%arg0: i32, %arg1: i32) -> (i32, i32, i32, i32) {
    %c0_i32 = arith.constant 0 : i32
    %c0_i32_0 = arith.constant 0 : i32
    %c0_i32_1 = arith.constant 0 : i32
    %c0_i32_2 = arith.constant 0 : i32
    return %arg1, %c0_i32, %c0_i32_0, %c0_i32_1 : i32, i32, i32, i32
  }
  func.func @transform_21(%arg0: i32, %arg1: i32) -> (i32, i32, i32) {
    %c0_i32 = arith.constant 0 : i32
    %c0_i32_0 = arith.constant 0 : i32
    %c0_i32_1 = arith.constant 0 : i32
    return %arg0, %c0_i32, %c0_i32_0 : i32, i32, i32
  }
}

</mosaic_0001>

<bundles_post_ra>
// kernel: tpu_custom_call.1
= control target key start
LH: loop header
LB: loop body
LE: loop exit
PB: predicated region body
PF: predicated region fallthrough
CT: control target
= control target key end

     0   :  { %s4239_s0 = inlined_call_operand.vmem [shape: f32[2,8,1], index: 0, kind: input, shape index: {}]   ;;  %s4240_s1 = inlined_call_operand.vmem [shape: f32[2,8,1], index: 1, kind: input, shape index: {}]   ;;  %s4241_s2 = inlined_call_operand.vmem [shape: f32[2,8,32], index: 2, kind: input, shape index: {}]   ;;  %s4242_s3 = inlined_call_operand.hbm [shape: f32[2,1,8], index: 3, kind: input, shape index: {}]   ;;  %s4243_s4 = inlined_call_operand.hbm [shape: f32[2,1,8], index: 4, kind: input, shape index: {}]   ;;  %s4244_s5 = inlined_call_operand.hbm [shape: f32[2,32], index: 5, kind: input, shape index: {}]   ;;  %s4245_s6 = inlined_call_operand.hbm [shape: f32[2,16], index: 6, kind: input, shape index: {}]   ;;  %s4246_s7 = inlined_call_operand.hbm [shape: f32[1,16], index: 7, kind: input, shape index: {}]   ;;  %s4247_s8 = inlined_call_operand.hbm [shape: bf16[16,32], index: 8, kind: input, shape index: {}]   ;;  %s4248_s9 = inlined_call_operand.hbm [shape: f32[1,32], index: 9, kind: input, shape index: {}]   ;;  %s4249_s10 = inlined_call_operand.hbm [shape: bf16[8,32], index: 10, kind: input, shape index: {}]   ;;  %s4250_s11 = inlined_call_operand.vmem [shape: bf16[32,32], index: 11, kind: input, shape index: {}]   ;;  %s4251_s12 = inlined_call_operand.hbm [shape: f32[3,1,32], index: 12, kind: input, shape index: {}]   ;;  %s4252_s13 = inlined_call_operand.vmem [shape: bf16[160,32], index: 13, kind: input, shape index: {}]   ;;  %s4253_s14 = inlined_call_operand.vmem [shape: bf16[32,128], index: 14, kind: input, shape index: {}]   ;;  %s4254_s15 = inlined_call_operand.hbm [shape: f32[1,128], index: 15, kind: input, shape index: {}]   ;;  %s4255_s16 = inlined_call_operand.vmem [shape: bf16[2,32,48], index: 16, kind: input, shape index: {}]   ;;  %s4256_s17 = inlined_call_operand.vmem [shape: f32[2,1,48], index: 17, kind: input, shape index: {}]   ;;  %s4257_s18 = inlined_call_operand.vmem [shape: bf16[2,16,32], index: 18, kind: input, shape index: {}]   ;;  %s4258_s19 = inlined_call_operand.vmem [shape: bf16[2,2,32,32], index: 19, kind: input, shape index: {}]   ;;  %s4259_s20 = inlined_call_operand.vmem [shape: f32[2,7,1,32], index: 20, kind: input, shape index: {}]   ;;  %s4260_s21 = inlined_call_operand.hbm [shape: f32[2,1,128], index: 21, kind: output, shape index: {}]  }
   0x1   :  { %4282 = sst [smem:[#allocation38_spill]] %s4239_s0 }
   0x2   :  { %4283 = sst [smem:[#allocation39_spill]] %s4240_s1 }
   0x3   :  { %4284 = sst [smem:[#allocation40_spill]] %s4241_s2 }
   0x4   :  { %4285 = sst [smem:[#allocation41_spill]] %s4242_s3 }
   0x5   :  { %4286 = sst [smem:[#allocation42_spill]] %s4243_s4 }
   0x6   :  { %4287 = sst [smem:[#allocation43_spill]] %s4244_s5 }
   0x7   :  { %4288 = sst [smem:[#allocation44_spill]] %s4245_s6 }
   0x8   :  { %4289 = sst [smem:[#allocation45_spill]] %s4246_s7 }
   0x9   :  { %4290 = sst [smem:[#allocation46_spill]] %s4247_s8 }
   0xa   :  { %4291 = sst [smem:[#allocation47_spill]] %s4248_s9 }
   0xb   :  { %4292 = sst [smem:[#allocation48_spill]] %s4249_s10 }
   0xc   :  { %4293 = sst [smem:[#allocation49_spill]] %s4250_s11 }
   0xd   :  { %4294 = sst [smem:[#allocation50_spill]] %s4251_s12 }
   0xe   :  { %4295 = sst [smem:[#allocation51_spill]] %s4252_s13 }
   0xf   :  { %4296 = sst [smem:[#allocation52_spill]] %s4253_s14 }
  0x10   :  { %4297 = sst [smem:[#allocation53_spill]] %s4254_s15 }
  0x11   :  { %4298 = sst [smem:[#allocation54_spill]] %s4255_s16 }
  0x12   :  { %4299 = sst [smem:[#allocation55_spill]] %s4256_s17 }
  0x13   :  { %4300 = sst [smem:[#allocation56_spill]] %s4257_s18 }
  0x14   :  { %4301 = sst [smem:[#allocation57_spill]] %s4258_s19 }
  0x15   :  { %4302 = sst [smem:[#allocation58_spill]] %s4259_s20 }
  0x16   :  { %4303 = sst [smem:[#allocation59_spill]] %s4260_s21 }
  0x17   :  { %26 = vsyncpa [#allocation4], 0 }
  0x18   :  { %28 = vsyncpa [#allocation4 + $0x1], 0 }
  0x19   :  { %29 = vsyncpa [#allocation7], 0 }
  0x1a   :  { %31 = vsyncpa [#allocation7 + $0x1], 0 }
  0x1b   :  { %32 = vsyncpa [#allocation10], 0 }
  0x1c   :  { %33 = vsyncpa [#allocation13], 0 }
  0x1d   :  { %34 = vsyncpa [#allocation16], 0 }
  0x1e   :  { %35 = vsyncpa [#allocation19], 0 }
  0x1f   :  { %36 = vsyncpa [#allocation5], 0 }
  0x20   :  { %38 = vsyncpa [#allocation5 + $0x1], 0  ;;  %s3572_s2 = smov 0   ;;  %s3574_s25 = smov 0  }
  0x21   :  { %s3576_s26 = smov 0   ;;  %s3578_s27 = smov 0  }
  0x22   :  { %s3580_s3 = smov 0   ;;  %s3582_s28 = smov 0  }
  0x23   :  { %s3584_s29 = smov 0   ;;  %s3586_s0 = smov 0  }
  0x24 LB: > { %4304 = sst [smem:[#allocation29_spill]] %s3402_s26  ;;  %s3613_s4 = sadd.s32 4294967295, %s3422_s0   ;;  %s3422_s0 = sphi %s3586_s0, %s44_s0   ;;  %s3418_s29 = sphi %s3584_s29, %s4375_s29   ;;  %s3414_s28 = sphi %s3582_s28, %s4379_s28   ;;  %s3410_s3 = sphi %s3580_s3, %s4373_s3   ;;  %s3406_s27 = sphi %s3578_s27, %s4372_s27   ;;  %s3402_s26 = sphi %s3576_s26, %s4378_s26   ;;  %s3398_s25 = sphi %s3574_s25, %s4377_s25   ;;  %s3394_s2 = sphi %s3572_s2, %s4376_s2  }
  0x25   : > { %4305 = sst [smem:[#allocation30_spill]] %s3406_s27  ;;  %p2560_p0 = scmp.ge.s32.totalorder %s3422_s0, 1 }
  0x26   : > { %4306 = sst [smem:[#allocation31_spill]] %s3410_s3  ;;  %p4268_p1 = scmp.eq.s32.totalorder %s3613_s4, 0 }
  0x27   : > { %4307 = sst [smem:[#allocation32_spill]] %s3414_s28  ;;  %p578_p2 = scmp.lt.s32.totalorder %s3422_s0, 5 }
  0x28   : > { %4308 = sst [smem:[#allocation33_spill]] %s3418_s29  ;;  %s3424_s5 = smov [#allocation8]  }
  0x29   : > { %p3618_p3 = pnand %p2560_p0, %p578_p2  ;;  %s591_s22 = sshll.u32 %s3424_s5, 4  ;;  %s592_s22 = int_to_ptr.vmem [resolvable:$true] %s591_s22 }
  0x2a   : > { %s3425_s23 = smov [#allocation9]   ;;  %s3426_s21 = smov [#allocation12]  }
  0x2b   : > { %s4309_s30 = scalar_select %p3618_p3, 1, 0 }
  0x2c   : > { %p2820_p4 = pneg %p3618_p3  ;;  %s602_s1 = sshll.u32 %s3425_s23, 4  ;;  %s3630_s1 = int_to_ptr.vmem [resolvable:$true] %s602_s1 }
  0x2d   : > { %4310 = sst [smem:[#allocation34_spill]] %s4309_s30  ;;  %s623_s14 = sshll.u32 %s3426_s21, 4  ;;  %s3632_s14 = int_to_ptr.vmem [resolvable:$true] %s623_s14 }
  0x2e   : > { %p3626_p5 = pnand %p2820_p4, %p4268_p1  ;;  %s4312_s5 = sld [smem:[#allocation43_spill]] }
  0x30   : > { %p3642_p7 = pneg %p3626_p5 }
  0x34   : > { %s3016_s20 = scalar_lea.hbm %s4312_s5, 32 }
  0x35   : > { %p3017_p6 = scmp.ne.s32.totalorder %s4312_s5, %s3016_s20  ;;  %p3023_p10 = scmp.lt.u32.totalorder %s3016_s20, %s4312_s5 }
  0x37   : > { %p3019_p8 = pnand %p3642_p7, %p3017_p6 }
  0x39   : > { %p3020_p9 = pneg %p3019_p8 }
  0x3b   : > { %p3025_p11 = pnand %p3023_p10, %p3020_p9 }
  0x3d   : > { %3028 = shalt.err (!%p3025_p11)
}
  0x3e   : > { %s3029_s11 = scalar_lea.vmem %s592_s22, 32  ;;  %p3037_p2 = scmp.lt.s32.totalorder %s592_s22, %s592_s22 }
  0x3f   : > { %p3030_p12 = scmp.ne.s32.totalorder %s592_s22, %s3029_s11  ;;  %p3038_p4 = scmp.lt.s32.totalorder %s3029_s11, %s3029_s11 }
  0x41   : > { %p3032_p13 = pnand %p3030_p12, %p3642_p7  ;;  %p3039_p1 = por %p3038_p4, %p3037_p2 }
  0x43   : > { %p3033_p0 = pneg %p3032_p13 }
  0x45   : > { %p3040_p3 = pnand %p3039_p1, %p3033_p0 }
  0x47   : > { %3043 = shalt.err (!%p3040_p3)
}
  0x48   : > { %2823 = dma.hbm_to_vmem [thread:$0]  (!%p3626_p5), %s4312_s5, 32, %s592_s22, [#allocation7]  }
  0x49   : > { %s4314_s6 = sld [smem:[#allocation44_spill]] }
  0x4f   : > { %s3044_s20 = scalar_lea.hbm %s4314_s6, 32 }
  0x50   : > { %p3045_p6 = scmp.ne.s32.totalorder %s4314_s6, %s3044_s20  ;;  %p3051_p1 = scmp.lt.u32.totalorder %s3044_s20, %s4314_s6 }
  0x52   : > { %p3047_p8 = pnand %p3045_p6, %p3642_p7 }
  0x54   : > { %p3048_p9 = pneg %p3047_p8 }
  0x56   : > { %p3053_p3 = pnand %p3051_p1, %p3048_p9 }
  0x58   : > { %3056 = shalt.err (!%p3053_p3)
}
  0x59   : > { %s3057_s22 = scalar_lea.vmem %s3630_s1, 32  ;;  %p3065_p13 = scmp.lt.s32.totalorder %s3630_s1, %s3630_s1 }
  0x5a   : > { %p3058_p10 = scmp.ne.s32.totalorder %s3630_s1, %s3057_s22  ;;  %p3066_p0 = scmp.lt.s32.totalorder %s3057_s22, %s3057_s22 }
  0x5c   : > { %p3060_p11 = pnand %p3058_p10, %p3642_p7  ;;  %p3067_p2 = por %p3066_p0, %p3065_p13 }
  0x5e   : > { %p3061_p12 = pneg %p3060_p11 }
  0x60   : > { %p3068_p4 = pnand %p3067_p2, %p3061_p12 }
  0x62   : > { %3071 = shalt.err (!%p3068_p4)
}
  0x63   : > { %2826 = dma.hbm_to_vmem [thread:$0]  (!%p3626_p5), %s4314_s6, 32, %s3630_s1, [#allocation10]  }
  0x64   : > { %s4315_s8 = sld [smem:[#allocation46_spill]] }
  0x6a   : > { %s3072_s17 = scalar_lea.hbm %s4315_s8, 128 }
  0x6b   : > { %p3073_p6 = scmp.ne.s32.totalorder %s4315_s8, %s3072_s17  ;;  %p3079_p1 = scmp.lt.u32.totalorder %s3072_s17, %s4315_s8 }
  0x6d   : > { %p3075_p8 = pnand %p3073_p6, %p3642_p7 }
  0x6f   : > { %p3076_p9 = pneg %p3075_p8 }
  0x71   : > { %p3081_p3 = pnand %p3079_p1, %p3076_p9 }
  0x73   : > { %3084 = shalt.err (!%p3081_p3)
}
  0x74   : > { %s3085_s1 = scalar_lea.vmem %s3632_s14, 128  ;;  %p3093_p13 = scmp.lt.s32.totalorder %s3632_s14, %s3632_s14 }
  0x75   : > { %p3086_p10 = scmp.ne.s32.totalorder %s3632_s14, %s3085_s1  ;;  %p3094_p0 = scmp.lt.s32.totalorder %s3085_s1, %s3085_s1 }
  0x77   : > { %p3088_p11 = pnand %p3086_p10, %p3642_p7  ;;  %p3095_p2 = por %p3094_p0, %p3093_p13 }
  0x79   : > { %p3089_p12 = pneg %p3088_p11 }
  0x7b   : > { %p3096_p4 = pnand %p3095_p2, %p3089_p12 }
  0x7d   : > { %3099 = shalt.err (!%p3096_p4)
}
  0x7e   : > { %s3427_s22 = smov 64   ;;  %s3428_s16 = smov 4  }
  0x7f   : > { %2832 = dma.hbm_to_vmem [thread:$0]  (!%p3626_p5), %s4315_s8, 128, %s3632_s14, [#allocation13], %s3427_s22, %s3427_s22, %s3428_s16  }
  0x80   : > { %s3429_s18 = smov [#allocation15]   ;;  %s3430_s19 = smov [#allocation11]  }
  0x81   : > { %s648_s17 = sshll.u32 %s3429_s18, 4  ;;  %s613_s20 = sshll.u32 %s3430_s19, 4  ;;  %s649_s17 = int_to_ptr.vmem [resolvable:$true] %s648_s17  ;;  %s614_s20 = int_to_ptr.vmem [resolvable:$true] %s613_s20 }
  0x82   : > { %s4316_s10 = sld [smem:[#allocation48_spill]] }
  0x88   : > { %s3100_s1 = scalar_lea.hbm %s4316_s10, 64 }
  0x89   : > { %p3101_p6 = scmp.ne.s32.totalorder %s4316_s10, %s3100_s1  ;;  %p3107_p1 = scmp.lt.u32.totalorder %s3100_s1, %s4316_s10 }
  0x8b   : > { %p3103_p8 = pnand %p3101_p6, %p3642_p7 }
  0x8d   : > { %p3104_p9 = pneg %p3103_p8 }
  0x8f   : > { %p3109_p3 = pnand %p3107_p1, %p3104_p9 }
  0x91   : > { %3112 = shalt.err (!%p3109_p3)
}
  0x92   : > { %s3113_s14 = scalar_lea.vmem %s649_s17, 64  ;;  %p3121_p13 = scmp.lt.s32.totalorder %s649_s17, %s649_s17 }
  0x93   : > { %p3114_p10 = scmp.ne.s32.totalorder %s649_s17, %s3113_s14  ;;  %p3122_p0 = scmp.lt.s32.totalorder %s3113_s14, %s3113_s14 }
  0x95   : > { %p3116_p11 = pnand %p3114_p10, %p3642_p7  ;;  %p3123_p2 = por %p3122_p0, %p3121_p13 }
  0x97   : > { %p3117_p12 = pneg %p3116_p11 }
  0x99   : > { %p3124_p4 = pnand %p3123_p2, %p3117_p12 }
  0x9b   : > { %3127 = shalt.err (!%p3124_p4)
}
  0x9c   : > { %2838 = dma.hbm_to_vmem [thread:$0]  (!%p3626_p5), %s4316_s10, 64, %s649_s17, [#allocation16]  }
  0x9d   : > { %s4317_s7 = sld [smem:[#allocation45_spill]] }
  0xa3   : > { %s3128_s22 = scalar_lea.hbm %s4317_s7, 16 }
  0xa4   : > { %p3129_p6 = scmp.ne.s32.totalorder %s4317_s7, %s3128_s22  ;;  %p3135_p1 = scmp.lt.u32.totalorder %s3128_s22, %s4317_s7 }
  0xa6   : > { %p3131_p8 = pnand %p3129_p6, %p3642_p7 }
  0xa8   : > { %p3132_p9 = pneg %p3131_p8 }
  0xaa   : > { %p3137_p3 = pnand %p3135_p1, %p3132_p9 }
  0xac   : > { %3140 = shalt.err (!%p3137_p3)
}
  0xad   : > { %s3141_s19 = scalar_lea.vmem %s614_s20, 16  ;;  %s3148_s17 = scalar_lea.vmem %s614_s20, 32 }
  0xae   : > { %p3142_p10 = scmp.ne.s32.totalorder %s614_s20, %s3141_s19  ;;  %p3149_p13 = scmp.lt.s32.totalorder %s614_s20, %s614_s20 }
  0xaf   : > { %p3150_p0 = scmp.lt.s32.totalorder %s3148_s17, %s3141_s19 }
  0xb0   : > { %p3144_p11 = pnand %p3142_p10, %p3642_p7 }
  0xb1   : > { %p3151_p2 = por %p3150_p0, %p3149_p13 }
  0xb2   : > { %p3145_p12 = pneg %p3144_p11 }
  0xb4   : > { %p3152_p4 = pnand %p3151_p2, %p3145_p12 }
  0xb6   : > { %3155 = shalt.err (!%p3152_p4)
}
  0xb7   : > { %2829 = dma.hbm_to_vmem [thread:$0]  (!%p3626_p5), %s4317_s7, 16, %s614_s20, [#allocation10]  }
  0xb8   : > { %s3431_s1 = smov [#allocation14]   ;;  %s3432_s6 = smov [#allocation17]  }
  0xb9   : > { %s637_s14 = sshll.u32 %s3431_s1, 4  ;;  %s661_s5 = sshll.u32 %s3432_s6, 4  ;;  %s638_s14 = int_to_ptr.vmem [resolvable:$true] %s637_s14  ;;  %s662_s5 = int_to_ptr.vmem [resolvable:$true] %s661_s5 }
  0xba   : > { %s4318_s9 = sld [smem:[#allocation47_spill]] }
  0xc0   : > { %s3156_s22 = scalar_lea.hbm %s4318_s9, 16 }
  0xc1   : > { %p3157_p6 = scmp.ne.s32.totalorder %s4318_s9, %s3156_s22  ;;  %p3163_p1 = scmp.lt.u32.totalorder %s3156_s22, %s4318_s9 }
  0xc3   : > { %p3159_p8 = pnand %p3157_p6, %p3642_p7 }
  0xc5   : > { %p3160_p9 = pneg %p3159_p8 }
  0xc7   : > { %p3165_p3 = pnand %p3163_p1, %p3160_p9 }
  0xc9   : > { %3168 = shalt.err (!%p3165_p3)
}
  0xca   : > { %s3169_s20 = scalar_lea.vmem %s638_s14, 16  ;;  %s3176_s19 = scalar_lea.vmem %s638_s14, 32 }
  0xcb   : > { %p3170_p10 = scmp.ne.s32.totalorder %s638_s14, %s3169_s20  ;;  %p3177_p13 = scmp.lt.s32.totalorder %s638_s14, %s638_s14 }
  0xcc   : > { %p3178_p0 = scmp.lt.s32.totalorder %s3176_s19, %s3169_s20 }
  0xcd   : > { %p3172_p11 = pnand %p3170_p10, %p3642_p7 }
  0xce   : > { %p3179_p2 = por %p3178_p0, %p3177_p13 }
  0xcf   : > { %p3173_p12 = pneg %p3172_p11 }
  0xd1   : > { %p3180_p4 = pnand %p3179_p2, %p3173_p12 }
  0xd3   : > { %3183 = shalt.err (!%p3180_p4)
}
  0xd4   : > { %2835 = dma.hbm_to_vmem [thread:$0]  (!%p3626_p5), %s4318_s9, 16, %s638_s14, [#allocation13]  }
  0xd5   : > { %s4319_s12 = sld [smem:[#allocation50_spill]] }
  0xdb   : > { %s3184_s6 = scalar_lea.hbm %s4319_s12, 48 }
  0xdc   : > { %p3185_p6 = scmp.ne.s32.totalorder %s4319_s12, %s3184_s6  ;;  %p3191_p1 = scmp.lt.u32.totalorder %s3184_s6, %s4319_s12 }
  0xde   : > { %p3187_p8 = pnand %p3185_p6, %p3642_p7 }
  0xe0   : > { %p3188_p9 = pneg %p3187_p8 }
  0xe2   : > { %p3193_p3 = pnand %p3191_p1, %p3188_p9 }
  0xe4   : > { %3196 = shalt.err (!%p3193_p3)
}
  0xe5   : > { %s3197_s27 = scalar_lea.vmem %s662_s5, 48  ;;  %s3204_s14 = scalar_lea.vmem %s662_s5, 64 }
  0xe6   : > { %p3198_p10 = scmp.ne.s32.totalorder %s662_s5, %s3197_s27  ;;  %p3205_p13 = scmp.lt.s32.totalorder %s662_s5, %s662_s5 }
  0xe7   : > { %p3206_p0 = scmp.lt.s32.totalorder %s3204_s14, %s3197_s27 }
  0xe8   : > { %p3200_p11 = pnand %p3198_p10, %p3642_p7 }
  0xe9   : > { %p3207_p2 = por %p3206_p0, %p3205_p13 }
  0xea   : > { %p3201_p12 = pneg %p3200_p11 }
  0xec   : > { %p3208_p4 = pnand %p3207_p2, %p3201_p12 }
  0xee   : > { %3211 = shalt.err (!%p3208_p4)
}
  0xef   : > { %s3433_s13 = smov 16   ;;  %s3434_s18 = smov 1  }
  0xf0   : > { %2841 = dma.hbm_to_vmem [thread:$0]  (!%p3626_p5), %s4319_s12, 48, %s662_s5, [#allocation16], %s3433_s13, %s3433_s13, %s3434_s18  }
  0xf1   : > { %s3435_s17 = smov [#allocation18]   ;;  %s4320_s15 = sld [smem:[#allocation53_spill]] }
  0xf2   : > { %s681_s21 = sshll.u32 %s3435_s17, 4  ;;  %s682_s21 = int_to_ptr.vmem [resolvable:$true] %s681_s21 }
  0xf7   : > { %s3212_s6 = scalar_lea.hbm %s4320_s15, 16 }
  0xf8   : > { %p3213_p6 = scmp.ne.s32.totalorder %s4320_s15, %s3212_s6  ;;  %p3219_p1 = scmp.lt.u32.totalorder %s3212_s6, %s4320_s15 }
  0xfa   : > { %p3215_p8 = pnand %p3213_p6, %p3642_p7 }
  0xfc   : > { %p3216_p9 = pneg %p3215_p8 }
  0xfe   : > { %p3221_p3 = pnand %p3219_p1, %p3216_p9 }
 0x100   : > { %3224 = shalt.err (!%p3221_p3)
}
 0x101   : > { %s3225_s5 = scalar_lea.vmem %s682_s21, 16  ;;  %s3232_s27 = scalar_lea.vmem %s682_s21, 32 }
 0x102   : > { %p3226_p10 = scmp.ne.s32.totalorder %s682_s21, %s3225_s5  ;;  %p3233_p13 = scmp.lt.s32.totalorder %s682_s21, %s682_s21 }
 0x103   : > { %p3234_p0 = scmp.lt.s32.totalorder %s3232_s27, %s3225_s5 }
 0x104   : > { %p3228_p11 = pnand %p3226_p10, %p3642_p7 }
 0x105   : > { %p3235_p2 = por %p3234_p0, %p3233_p13 }
 0x106   : > { %p3229_p12 = pneg %p3228_p11 }
 0x108   : > { %p3236_p4 = pnand %p3235_p2, %p3229_p12 }
 0x10a   : > { %3239 = shalt.err (!%p3236_p4)
}
 0x10b   : > { %2844 = dma.hbm_to_vmem [thread:$0]  (!%p3626_p5), %s4320_s15, 16, %s682_s21, [#allocation19]  }
 0x10c   : > { %s2559_s23 = sadd.s32 4294967294, %s3422_s0   ;;  %s53_s18 = sadd.s32 1, %s3414_s28 }
 0x10d   : > { %p54_p7 = scmp.ge.s32.totalorder %s53_s18, 2  ;;  %s56_s24 = sadd.s32 1, %s3418_s29 }
 0x10e   : > { %s141_s20 = sadd.s32 1, %s3402_s26  ;;  %p148_p6 = scmp.ne.s32.totalorder %s3402_s26, %s3398_s25 }
 0x10f   : > { %s4381_s18 = smov (%p54_p7, %s53_s18), 0  ;;  %s4383_s24 = smov (!%p54_p7, %s56_s24), %s3418_s29 }
 0x110   : > { %4321 = sst [smem:[#allocation35_spill]] %s4381_s18  ;;  %p149_p8 = scmp.eq.s32.totalorder %s3422_s0, 0 }
 0x111   : > { %p154_p9 = scmp.ne.s32.totalorder %s3398_s25, %s3394_s2  ;;  %p58_p1 = scmp.ge.s32.totalorder %s4383_s24, 2 }
 0x112   : > { %p565_p3 = scmp.eq.s32.totalorder %s3613_s4, 3  ;;  %p3807_p10 = por %p149_p8, %p148_p6 }
 0x113   : > { %p4323_p5 = scmp.eq.s32.totalorder %s3613_s4, 0  ;;  %s4385_s24 = smov (%p58_p1, %s4383_s24), 0 }
 0x114   : > { %4325 = sst [smem:[#allocation36_spill]] %s4385_s24  ;;  %p3819_p12 = por %p565_p3, %p148_p6 }
 0x115   : > { %p3813_p11 = por %p4323_p5, %p154_p9  ;;  %p571_p13 = scmp.eq.s32.totalorder %s2559_s23, 3 }
 0x116   : > { %s4326_s21 = scalar_select %p3819_p12, 1, 0 }
 0x117   : > { %s4324_s17 = scalar_select %p3813_p11, 1, 0 }
 0x118   : > { %s138_s11 = ssub.s32 %s3418_s29, %s4385_s24  ;;  %p2864_p0 = scmp.lt.s32.totalorder %s3422_s0, 4 }
 0x119   : > { %p139_p2 = scmp.eq.s32.totalorder %s138_s11, 0  ;;  %p3826_p4 = por %p571_p13, %p154_p9 }
 0x11a   : > { %s3831_s6 = sand.u32 1, %s3402_s26   ;;  %s2570_s3 = sshll.u32 %s3418_s29, 4 }
 0x11b   : > { %s4327_s1 = scalar_select %p3826_p4, 1, 0 }
 0x11c   : > { %s3835_s30 = scalar_select %p139_p2, %s3402_s26, %s141_s20  }
 0x11d   : > { %s4329_s5 = sld [smem:[#allocation41_spill]]  ;;  %s716_s14 = scalar_lea.vmem [#allocation3], %s3831_s6 }
 0x11e   : > { %4328 = sst [smem:[#allocation37_spill]] %s3835_s30  ;;  %s723_s13 = sshll.u32 %s716_s14, 4  ;;  %s3843_s13 = int_to_ptr.vmem [resolvable:$true] %s723_s13 }
 0x11f   : > { %p3847_p7 = pnand %p2864_p0, %p3807_p10  ;;  %s4331_s16 = sld [smem:[#allocation42_spill]] }
 0x120   : > { %s714_s8 = scalar_lea.sflag [#allocation4], %s3831_s6 }
 0x121   : > { %p3242_p8 = pneg %p3847_p7 }
 0x123   : > { %s3840_s27 = scalar_lea.hbm %s4329_s5, %s2570_s3  ;;  %s3245_s10 = scalar_lea.hbm %s4329_s5, 32 }
 0x124   : > { %s3240_s9 = scalar_lea.hbm %s3840_s27, 16  ;;  %p3246_p3 = scmp.lt.u32.totalorder %s3840_s27, %s4329_s5 }
 0x125   : > { %s3855_s7 = scalar_lea.hbm %s4331_s16, %s2570_s3  ;;  %p3241_p6 = scmp.ne.s32.totalorder %s3840_s27, %s3240_s9 }
 0x126   : > { %p3247_p10 = scmp.lt.u32.totalorder %s3245_s10, %s3240_s9  ;;  %p3249_p13 = scmp.lt.u32.totalorder %s3240_s9, %s3840_s27 }
 0x127   : > { %p3243_p9 = pnand %p3242_p8, %p3241_p6 }
 0x128   : > { %p3248_p5 = por %p3247_p10, %p3246_p3 }
 0x129   : > { %p3244_p1 = pneg %p3243_p9 }
 0x12a   : > { %p3250_p0 = por %p3249_p13, %p3248_p5 }
 0x12c   : > { %p3251_p2 = pnand %p3250_p0, %p3244_p1 }
 0x12e   : > { %3254 = shalt.err (!%p3251_p2)
}
 0x12f   : > { %s3255_s3 = scalar_lea.vmem %s3843_s13, 16  ;;  %s3436_s11 = smov [#allocation3]  }
 0x130   : > { %p3256_p6 = scmp.ne.s32.totalorder %s3843_s13, %s3255_s3  ;;  %s3260_s22 = sshll.u32 %s3436_s11, 4  ;;  %s3261_s22 = int_to_ptr.vmem [resolvable:$false] %s3260_s22 }
 0x131   : > { %s3262_s12 = scalar_lea.vmem %s3261_s22, 32  ;;  %p3263_p12 = scmp.lt.s32.totalorder %s3843_s13, %s3261_s22 }
 0x132   : > { %p3258_p9 = pnand %p3256_p6, %p3242_p8  ;;  %p3264_p3 = scmp.lt.s32.totalorder %s3262_s12, %s3255_s3 }
 0x134   : > { %p3259_p4 = pneg %p3258_p9  ;;  %p3265_p10 = por %p3264_p3, %p3263_p12 }
 0x136   : > { %p3266_p5 = pnand %p3265_p10, %p3259_p4 }
 0x138   : > { %3269 = shalt.err (!%p3266_p5)
}
 0x139   : > { %2848 = dma.hbm_to_vmem [thread:$0]  (!%p3847_p7), %s3840_s27, 16, %s3843_s13, %s714_s8  }
 0x13a   : > { %s733_s9 = scalar_lea.vmem [#allocation6], %s3831_s6  ;;  %s4332_s20 = sand.u32 1, %s3422_s0  }
 0x13b   : > { %s740_s10 = sshll.u32 %s733_s9, 4  ;;  %s731_s19 = scalar_lea.sflag [#allocation7], %s4332_s20  ;;  %s741_s10 = int_to_ptr.vmem [resolvable:$true] %s740_s10 }
 0x13c   : > { %s3270_s14 = scalar_lea.hbm %s3855_s7, 16  ;;  %s3275_s22 = scalar_lea.hbm %s4331_s16, 32 }
 0x13d   : > { %p3271_p12 = scmp.ne.s32.totalorder %s3855_s7, %s3270_s14  ;;  %p3276_p13 = scmp.lt.u32.totalorder %s3855_s7, %s4331_s16 }
 0x13e   : > { %p3277_p0 = scmp.lt.u32.totalorder %s3275_s22, %s3270_s14  ;;  %p3279_p6 = scmp.lt.u32.totalorder %s3270_s14, %s3855_s7 }
 0x13f   : > { %p3273_p4 = pnand %p3271_p12, %p3242_p8 }
 0x140   : > { %p3278_p2 = por %p3277_p0, %p3276_p13 }
 0x141   : > { %p3274_p1 = pneg %p3273_p4 }
 0x142   : > { %p3280_p9 = por %p3279_p6, %p3278_p2 }
 0x144   : > { %p3281_p3 = pnand %p3280_p9, %p3274_p1 }
 0x146   : > { %3284 = shalt.err (!%p3281_p3)
}
 0x147   : > { %s3285_s8 = scalar_lea.vmem %s741_s10, 16  ;;  %s3437_s6 = smov [#allocation6]  }
 0x148   : > { %p3286_p10 = scmp.ne.s32.totalorder %s741_s10, %s3285_s8  ;;  %s3290_s27 = sshll.u32 %s3437_s6, 4  ;;  %s3291_s27 = int_to_ptr.vmem [resolvable:$false] %s3290_s27 }
 0x149   : > { %s3292_s13 = scalar_lea.vmem %s3291_s27, 32  ;;  %p3293_p4 = scmp.lt.s32.totalorder %s741_s10, %s3291_s27 }
 0x14a   : > { %p3288_p5 = pnand %p3286_p10, %p3242_p8  ;;  %p3294_p11 = scmp.lt.s32.totalorder %s3292_s13, %s3285_s8 }
 0x14c   : > { %p3289_p12 = pneg %p3288_p5  ;;  %p3295_p0 = por %p3294_p11, %p3293_p4 }
 0x14e   : > { %p3296_p13 = pnand %p3295_p0, %p3289_p12 }
 0x150   : > { %3299 = shalt.err (!%p3296_p13)
}
 0x151   : > { %2851 = dma.hbm_to_vmem [thread:$0]  (!%p3847_p7), %s3855_s7, 16, %s741_s10, %s731_s19  }
 0x152   : > { %s4333_s5 = sld [smem:[#allocation34_spill]] }
 0x158   : > { %p4334_p1 = scmp.ne.s32.totalorder %s4333_s5, 0 }
 0x159   : > { %s3908_s9 = sand.u32 (!%p4334_p1), 1, %s3398_s25   ;;  %p4335_p8 = scmp.ne.s32.totalorder (!%p4334_p1), %s4324_s17, 0 }
 0x15a   : > { %786 = sbr.rel (%p4334_p1) target bundleno = 3948 (0xf6c), region = 104  ;;  %s789_s20 = scalar_lea.sflag (!%p4334_p1), [#allocation4], %s3908_s9 }
 0x161   : > { %3361 = dma.done.wait (%p4335_p8), %s789_s20, 16  }
 0x162   : > { %3363 = vsyncadd (%p4335_p8), %s789_s20, 4294967280  ;;  %s796_s7 = sand.u32 1, %s3613_s4  }
 0x163   : > { %s797_s23 = scalar_lea.sflag [#allocation7], %s796_s7 }
 0x164   : > { %3365 = dma.done.wait (%p4335_p8), %s797_s23, 16  }
 0x165   : > { %3367 = vsyncadd (%p4335_p8), %s797_s23, 4294967280  ;;  %p4336_p11 = scmp.eq.s32.totalorder %s3613_s4, 0 }
 0x167   : > { %3369 = dma.done.wait (%p4336_p11), [#allocation7], 32   ;;  %p4337_p7 = pmov %p4336_p11 }
 0x169   : > { %3371 = vsyncadd (%p4337_p7), [#allocation7], 4294967264  ;;  %p4338_p2 = pmov %p4337_p7 }
 0x16b   : > { %3373 = dma.done.wait (%p4338_p2), [#allocation10], 48   ;;  %p4339_p6 = pmov %p4338_p2 }
 0x16c   : > { %p4340_p9 = pmov %p4338_p2 }
 0x16d   : > { %3375 = vsyncadd (%p4339_p6), [#allocation10], 4294967248 }
 0x16e   : > { %3377 = dma.done.wait (%p4340_p9), [#allocation13], 144   ;;  %p4341_p3 = pmov %p4338_p2 }
 0x16f   : > { %p4342_p10 = pmov %p4338_p2 }
 0x170   : > { %3379 = vsyncadd (%p4341_p3), [#allocation13], 4294967152 }
 0x171   : > { %3381 = dma.done.wait (%p4342_p10), [#allocation16], 112   ;;  %p4343_p5 = pmov %p4338_p2 }
 0x172   : > { %p4344_p12 = pmov %p4338_p2 }
 0x173   : > { %3383 = vsyncadd (%p4343_p5), [#allocation16], 4294967184 }
 0x174   : > { %3385 = dma.done.wait (%p4344_p12), [#allocation19], 16   ;;  %p4345_p4 = pmov %p4338_p2 }
 0x175   : > { %s4346_s17 = sld [smem:[#allocation31_spill]]  ;;  %s4347_s19 = sld [smem:[#allocation30_spill]] }
 0x176   : > { %3387 = vsyncadd (%p4345_p4), [#allocation19], 4294967280  ;;  %s4348_s12 = sld [smem:[#allocation38_spill]]  ;;  %s4349_s13 = sld [smem:[#allocation39_spill]] }
 0x177   : > { %s4352_s4 = sld [smem:[#allocation55_spill]]  ;;  %s4353_s6 = sld [smem:[#allocation56_spill]] }
 0x178   : > { %s4354_s7 = sld [smem:[#allocation57_spill]]  ;;  %s925_s29 = scalar_lea.vmem [#allocation20], %s3908_s9 }
 0x17b   : > { %p926_p0 = scmp.lt.s32.totalorder %s4346_s17, 1  ;;  %p938_p13 = scmp.lt.s32.totalorder %s4347_s19, 1 }
 0x17c   : > { %p2590_p1 = scmp.ne.s32.totalorder %s4347_s19, 0 }
 0x17d   : > { %s4387_s17 = smov (!%p926_p0, %s4346_s17), 1  ;;  %v3438_v1 = vmov (!%p2590_p1), 0   ;;  %v2974_v3 = vld [vmem:[#allocation12] sm:$0xff] (!%p2590_p1)   ;;  %v3439_v4 = vmov (!%p2590_p1), 0.0   ;;  %vm3440_vm0 = vmmov (!%p2590_p1), 0   ;;  %v973_v5 = vlaneseq (!%p2590_p1)  ;;  %s4356_s18 = sld [smem:[#allocation40_spill]] (!%p2590_p1) }
 0x17e   : > { %s3946_s3 = scalar_select %p938_p13, %s4347_s19, 1 }
 0x17f   : > { %s3948_s11 = sshll.u32 %s4387_s17, 3  ;;  %s4351_s17 = sld [smem:[#allocation54_spill]]  ;;  %2973 = vset.pattern.permute.xlu0 (!%p2590_p1), %v3438_v1  ;;  %2692 = vmatprep.subr.bf16.mxu0 (!%p2590_p1), %v3439_v4  ;;  %v974_v6 = vshrl.u32 (!%p2590_p1), %v973_v5, 7  ;;  %v967_v9 = vld [vmem:[#allocation9] sm:$0x3] (!%p2590_p1)  ;;  %vm1014_vm2 = vcmask (!%p2590_p1), 130048  }
 0x180   : > { %s929_s8 = scalar_lea.vmem %s4348_s12, %s3948_s11  ;;  %s933_s5 = scalar_lea.vmem %s4349_s13, %s3948_s11  ;;  %2693 = vmatpush3.bf16.msra.mxu0 (!%p2590_p1), %v2974_v3  ;;  %2694 = vmatprep.mubr.msk.bf16.mxu0 (!%p2590_p1), %vm3440_vm0, %v3439_v4  ;;  %v2595_v10 = vld [vmem:[#allocation8] ss:$0 sm:$0xff] (!%p2590_p1)  ;;  %v2591_v20 = vld [vmem:[#allocation11] ss:$0 sm:$0xff] (!%p2590_p1)  ;;  %v3441_v33 = vmov (!%p2590_p1), 683565275  }
 0x181   : > { %s2660_s14 = sshll.u32 %s3946_s3, 4  ;;  %s945_s22 = scalar_lea.vmem %s4352_s4, %s3946_s3  ;;  %v965_v0 = vld [vmem:[%s929_s8] sm:$0xff] (!%p2590_p1)  ;;  %v3992_v7 = vsub.s32 (!%p2590_p1), 0, %v974_v6  ;;  %v985_v8 = vsub.s32 (!%p2590_p1), 1, %v974_v6  ;;  %v3442_v35 = vmov (!%p2590_p1), 2475754826  }
 0x182   : > { %s2661_s28 = sshll.u32 %s3946_s3, 3  ;;  %s2662_s12 = sshll.u32 %s3946_s3, 5  ;;  %970 = vperm.xlu0 (!%p2590_p1), %2973, %v965_v0   ;;  %v966_v2 = vld [vmem:[%s933_s5] sm:$0xff] (!%p2590_p1)  ;;  %v3443_v38 = vmov (!%p2590_p1), 2131351028  }
 0x183   : > { %s3977_s27 = scalar_lea.vmem %s4353_s6, %s2661_s28  ;;  %s3982_s23 = scalar_lea.vmem %s4354_s7, %s2662_s12  ;;  %v976_v12 = vrot.slane (!%p2590_p1), %v967_v9, %v3992_v7  ;;  %v986_v14 = vrot.slane (!%p2590_p1), %v967_v9, %v985_v8  ;;  %v3444_v41 = vmov (!%p2590_p1), 2102212464   ;;  %v3445_v44 = vmov (!%p2590_p1), 920167782  }
 0x184   : > { %s2777_s10 = smul.u32 7, %s3946_s3  ;;  %v3446_v47 = vmov (!%p2590_p1), 1326507024   ;;  %s4357_s30 = scalar_lea.vmem (!%p2590_p1), %s4356_s18, %s3948_s11 }
 0x185   : > { %s3966_s24 = scalar_lea.vmem %s4351_s17, %s2660_s14  ;;  %s4355_s14 = sld [smem:[#allocation58_spill]] }
 0x186   : > { %964 = sbr.rel (%p2590_p1) target bundleno = 747 (0x2eb), region = 148  ;;  %980 = vperm.xlu0 (!%p2590_p1), %2973, %v966_v2  }
 0x18b   : > { %s3988_s17 = scalar_lea.vmem %s4355_s14, %s2777_s10 }
 0x201   : > { %v971_v11 = vpop.permute.xlu0 %970 }
 0x202   : > { %v3995_v13 = vmul.f32 %v2595_v10, %v971_v11  ;;  %v977_v17 = vmul.f32 %v976_v12, %v971_v11 }
 0x204   : > { %v1068_v15 = vand.u32 2139095040, %v3995_v13  ;;  %v1065_v25 = vand.u32 2147483647, %v3995_v13  ;;  %vm1067_vm9 = vcmp.lt.s32.totalorder %v3995_v13, 0 }
 0x205   : > { %v981_v16 = vpop.permute.xlu0 %980 }
 0x206   : > { %v1069_v18 = vshrl.u32 %v1068_v15, 23  ;;  %v987_v19 = vmul.f32 %v986_v14, %v981_v16  ;;  %v1072_v30 = vand.u32 8388607, %v1065_v25  ;;  %vm1066_vm10 = vcmp.le.f32.partialorder %v1065_v25, 0.7853982 }
 0x208   : > { %v2596_v21 = vadd.s32 4294967169, %v1069_v18  ;;  %v988_v22 = vadd.f32 %v987_v19, %v977_v17  ;;  %v1073_v49 = vor.u32 8388608, %v1072_v30 }
 0x20a   : > { %v1075_v23 = vadd.s32 1, %v2596_v21  ;;  %v996_v24 = vadd.f32 %v2591_v20, %v988_v22  ;;  %v1113_v63 = vshll.u32 %v1073_v49, 8 }
 0x20c   : > { %vm1076_vm1 = vcmp.gt.s32.totalorder %v1075_v23, 0  ;;  %v997_v26 = vmax.f32 %v996_v24, 0.0 }
 0x20d   : > { %v1077_v27 = vsel %vm1076_vm1, %v1075_v23, 0  ;;  %vm1157_vm1 = vweird.f32 %v3995_v13 }
 0x20e   : > { %v1079_v28 = vand.u32 31, %v1077_v27  ;;  %v998_v29 = vpack.c.bf16 %v997_v26, %v997_v26  ;;  %v1078_v32 = vshrl.u32 %v1077_v27, 5 }
 0x210   : > { %v1080_v31 = vsub.s32 32, %v1079_v28  ;;  %2695 = vmatmul.mubr.msk.bf16.vlgmr.msra.gmra.mrb[0].mxu0 %vm1014_vm2, %v998_v29  ;;  %v1082_v34 = vshll.u32 %v3441_v33, %v1079_v28  ;;  %v1085_v36 = vshll.u32 %v3442_v35, %v1079_v28  ;;  %v1088_v40 = vshll.u32 %v3443_v38, %v1079_v28 }
 0x211   : > { %v1091_v43 = vshll.u32 %v3444_v41, %v1079_v28  ;;  %v1094_v46 = vshll.u32 %v3445_v44, %v1079_v28  ;;  %vm1097_vm3 = vcmp.lt.s32.totalorder %v1078_v32, 1  ;;  %vm1100_vm4 = vcmp.lt.s32.totalorder %v1078_v32, 4 }
 0x212   : > { %v1083_v37 = vshrl.u32 %v3442_v35, %v1080_v31  ;;  %v1086_v39 = vshrl.u32 %v3443_v38, %v1080_v31  ;;  %v1089_v42 = vshrl.u32 %v3444_v41, %v1080_v31  ;;  %v1092_v45 = vshrl.u32 %v3445_v44, %v1080_v31  ;;  %v1059_v44 = vld [vmem:[#allocation8 + $0x1] sm:$0x1] }
 0x213   : > { %v1095_v48 = vshrl.u32 %v3446_v47, %v1080_v31  ;;  %v1081_v58 = vshrl.u32 %v3441_v33, %v1080_v31  ;;  %vm1099_vm5 = vcmp.lt.s32.totalorder %v1078_v32, 3  ;;  %vm1098_vm6 = vcmp.lt.s32.totalorder %v1078_v32, 2 }
 0x214   : > { %v1084_v50 = vor.u32 %v1083_v37, %v1082_v34  ;;  %v1087_v51 = vor.u32 %v1086_v39, %v1085_v36  ;;  %v1090_v52 = vor.u32 %v1089_v42, %v1088_v40  ;;  %v1093_v53 = vor.u32 %v1092_v45, %v1091_v43 }
 0x215   : > { %v1096_v54 = vor.u32 %v1095_v48, %v1094_v46  ;;  %v1174_v46 = vsub.f32 1.0, %v1059_v44  ;;  %vm1287_vm2 = vcmask 261120  }
 0x216   : > { %v1102_v55 = vsel %vm1100_vm4, %v1090_v52, 2102212464  ;;  %v1105_v56 = vsel %vm1097_vm3, %v1084_v50, %v1087_v51  ;;  %v1109_v57 = vsel %vm1097_vm3, %v1087_v51, %v1090_v52  ;;  %v1106_v59 = vsel %vm1100_vm4, %v1093_v53, 920167782 }
 0x217   : > { %v1110_v60 = vsel %vm1100_vm4, %v1096_v54, 1326507024  ;;  %v1107_v61 = vsel %vm1099_vm5, %v1090_v52, %v1106_v59  ;;  %v1101_v0 = vsel %vm1097_vm3, %v1081_v58, %v1084_v50  ;;  %v1103_v1 = vsel %vm1099_vm5, %v1087_v51, %v1102_v55 }
 0x218   : > { %v1111_v62 = vsel %vm1099_vm5, %v1093_v53, %v1110_v60  ;;  %v1108_v2 = vsel %vm1098_vm6, %v1105_v56, %v1107_v61  ;;  %v1104_v9 = vsel %vm1098_vm6, %v1101_v0, %v1103_v1  ;;  %v1172_v51 = vrot.slane %v1059_v44, %v3992_v7  ;;  %v2592_v0 = vld [vmem:[#allocation14] ss:$0 sm:$0xff] }
 0x219   : > { %v1112_v3 = vsel %vm1098_vm6, %v1109_v57, %v1111_v62  ;;  %v4004_v6 = vmul.u32.u64.low %v1113_v63, %v1108_v2  ;;  %v4005_v8 = vmul.u32.u64.high %v1113_v63, %v1108_v2, %v4004_v6  ;;  %v1120_v11 = vmul.u32 %v1113_v63, %v1104_v9  ;;  %v1284_v1 = vld [vmem:[%s4357_s30] sm:$0xff] }
 0x21a   : > { %v4001_v4 = vmul.u32.u64.low %v1113_v63, %v1112_v3  ;;  %v4002_v5 = vmul.u32.u64.high %v1113_v63, %v1112_v3, %v4001_v4  ;;  %v1281_v25 = vrot.slane %v1174_v46, %v3992_v7 }
 0x21b   : > { %v1123_v10 = vadd.s32 1, %v4005_v8 }
 0x21c   : > { %vm1122_vm7 = vc.u32 %v4002_v5, %v4004_v6  ;;  %v1121_v24 = vadd.s32 %v4004_v6, %v4002_v5 }
 0x21d   : > { %v1124_v12 = vsel %vm1122_vm7, %v1123_v10, %v4005_v8 }
 0x21e   : > { %v1125_v14 = vadd.s32 %v1124_v12, %v1120_v11 }
 0x220   : > { %v1126_v15 = vadd.s32 536870912, %v1125_v14 }
 0x222   : > { %v1127_v16 = vshrl.u32 %v1126_v15, 30 }
 0x224   : > { %v1128_v17 = vshll.u32 %v1127_v16, 30  ;;  %v1151_v37 = vsub.s32 4, %v1127_v16 }
 0x226   : > { %v1129_v18 = vsub.s32 %v1125_v14, %v1128_v17  ;;  %v1152_v40 = vsel %vm1067_vm9, %v1151_v37, %v1127_v16 }
 0x227   : > { %v1154_v42 = vsel %vm1066_vm10, 0, %v1152_v40 }
 0x228   : > { %v1131_v19 = vsub.s32 0, %v1129_v18  ;;  %v1158_v43 = vadd.s32 3, %v1154_v42  ;;  %v1268_v47 = vand.u32 3, %v1154_v42 }
 0x22a   : > { %v2597_v20 = vmin.u32 %v1131_v19, %v1129_v18  ;;  %v1159_v45 = vand.u32 3, %v1158_v43  ;;  %vm1273_vm12 = vcmp.eq.s32.totalorder %v1268_v47, 2  ;;  %vm1270_vm14 = vcmp.eq.s32.totalorder %v1268_v47, 0 }
 0x22b   : > { %vm1269_vm0 = vcmp.lt.s32.totalorder %v1268_v47, 2 }
 0x22c   : > { %v1133_v21 = vclz %v2597_v20  ;;  %vm1164_vm11 = vcmp.eq.s32.totalorder %v1159_v45, 2  ;;  %vm1161_vm13 = vcmp.eq.s32.totalorder %v1159_v45, 0  ;;  %vm1160_vm15 = vcmp.lt.s32.totalorder %v1159_v45, 2 }
 0x22e   : > { %v2598_v22 = vadd.s32 4294967294, %v1133_v21 }
 0x230   : > { %vm2599_vm8 = vcmp.lt.s32.totalorder %v2598_v22, 0 }
 0x231   : > { %v1136_v23 = vsel %vm2599_vm8, 0, %v2598_v22 }
 0x232   : > { %v1137_v26 = vsub.s32 32, %v1136_v23  ;;  %v1141_v27 = vsub.s32 4294967266, %v1136_v23  ;;  %v1138_v28 = vshll.u32 %v1129_v18, %v1136_v23 }
 0x234   : > { %v1139_v29 = vshrl.u32 %v1121_v24, %v1137_v26  ;;  %v1142_v30 = vadd.s32 127, %v1141_v27 }
 0x236   : > { %v1140_v31 = vor.u32 %v1139_v29, %v1138_v28  ;;  %v1143_v32 = vshll.u32 %v1142_v30, 23 }
 0x238   : > { %v1144_v33 = vor.u32 4788187, %v1143_v32  ;;  %v1147_v35 = vcvt.s32.f32 %v1140_v31 }
 0x23a   : > { %v1145_v34 = vand.u32 2147483647, %v1144_v33 }
 0x23c   : > { %v1148_v36 = vmul.f32 %v1147_v35, %v1145_v34 }
 0x23e   : > { %v1149_v38 = vxor.u32 2147483648, %v1148_v36 }
 0x240   : > { %v1150_v39 = vsel %vm1067_vm9, %v1149_v38, %v1148_v36 }
 0x241   : > { %v1153_v41 = vsel %vm1066_vm10, %v3995_v13, %v1150_v39 }
 0x242   : > { %2975 = vcosq.f32 %v1153_v41 }
 0x243   : > { %2977 = vsinq.f32 %v1153_v41 }
 0x24c   : > { %v2976_v48 = vpop.eup %2975 }
 0x24d   : > { %v2978_v49 = vpop.eup %2977  ;;  %v1165_v50 = vxor.u32 2147483648, %v2976_v48 }
 0x24e   : > { %v1162_v52 = vxor.u32 2147483648, %v2978_v49 }
 0x24f   : > { %v1166_v53 = vsel %vm1164_vm11, %v1165_v50, %v2978_v49  ;;  %v1275_v54 = vsel %vm1273_vm12, %v1165_v50, %v2978_v49 }
 0x250   : > { %v1163_v55 = vsel %vm1161_vm13, %v2976_v48, %v1162_v52  ;;  %v1272_v56 = vsel %vm1270_vm14, %v2976_v48, %v1162_v52 }
 0x251   : > { %v1167_v57 = vsel %vm1160_vm15, %v1163_v55, %v1166_v53  ;;  %v1276_v58 = vsel %vm1269_vm0, %v1272_v56, %v1275_v54 }
 0x252   : > { %v1168_v59 = vsel %vm1157_vm1, nan, %v1167_v57  ;;  %v1277_v60 = vsel %vm1157_vm1, nan, %v1276_v58 }
 0x253   : > { %v1173_v61 = vmul.f32 %v1172_v51, %v1168_v59  ;;  %v1282_v62 = vmul.f32 %v1281_v25, %v1277_v60 }
 0x255   : > { %v1283_v63 = vadd.f32 %v1282_v62, %v1173_v61 }
 0x2e3   : > { %v1052_v7 = vpop.f32.mrb[0].mxu0 }
 0x2e4   : > { %v1053_v2 = vadd.f32 %v2592_v0, %v1052_v7  ;;  %v2696_v3 = vpop.f32.mrb[1].mxu0 }
 0x2e5   : > { %v1055_v4 = vpop.f32.mrb[2].mxu0 }
 0x2e6   : > { %v1285_v5 = vadd.f32 %v1284_v1, %v1053_v2  ;;  %v2697_v6 = vpop.f32.mrb[3].mxu0 }
 0x2e8   : > { %v1286_v13 = vadd.f32 %v1285_v5, %v1283_v63 }
 0x2ea   : > { %1288 = vst.msk [vmem:[#allocation2] sm:$0xff] %vm1287_vm2, %v1286_v13 }
 0x2eb PF: > { %v2979_v8 = vld [vmem:[%s3966_s24] sm:$0xff]   ;;  %v3447_v9 = vmov 0.0   ;;  %v2980_v10 = vld [vmem:[%s3966_s24 + $0x8] sm:$0xff]   ;;  %vm3448_vm3 = vmmov 0   ;;  %vm1317_vm4 = vcmask 261120   ;;  %s3449_s11 = smov 120   ;;  %v1363_v27 = vlaneseq }
 0x2ec   : > { %2698 = vmatprep.subr.bf16.mxu0 %v3447_v9  ;;  %2706 = vmatprep.subr.bf16.mxu1 %v3447_v9  ;;  %v2605_v14 = vld [vmem:[%s945_s22] ss:$0 sm:$0xff]  ;;  %s3450_s8 = smov 112   ;;  %s3451_s5 = smov 104   ;;  %vm1371_vm5 = vcmask 64512   ;;  %vm1435_vm6 = vcmask 1043456  }
 0x2ed   : > { %2699 = vmatpush3.bf16.msra.mxu0 %v2979_v8  ;;  %2702 = vmatprep.mubr.msk.bf16.mxu0 %vm3448_vm3, %v3447_v9  ;;  %s4359_s3 = scalar_lea.vmem [#allocation3], %s3908_s9  ;;  %v4057_v30 = vshrl.u32 %v1363_v27, 7  ;;  %s3452_s4 = smov 96   ;;  %v2981_v2 = vld [vmem:[%s3977_s27] sm:$0xff]   ;;  %vm1610_vm7 = vcmask 130048  }
 0x2ee   : > { %2700 = vmatprep.subr.bf16.mxu0 %v3447_v9  ;;  %2708 = vmatprep.mubr.msk.bf16.mxu1 %vm3448_vm3, %v3447_v9  ;;  %v1289_v28 = vld [vmem:[%s4359_s3] sm:$0x1]  ;;  %s3453_s22 = smov 88   ;;  %s3454_s12 = smov 8  }
 0x2ef   : > { %v2604_v29 = vadd.f32 -1.0, %v1289_v28  ;;  %v1365_v32 = vsub.s32 0, %v4057_v30  ;;  %s4360_s6 = sld [smem:[#allocation30_spill]] }
 0x2f1   : > { %v4029_v11 = vld [vmem:[#allocation2] sm:$0xff]  ;;  %2701 = vmatpush3.bf16.msra.mxu0 %v2980_v10  ;;  %v1291_v31 = vmul.f32 1e+30, %v2604_v29 }
 0x2f2   : > { %v1293_v12 = vpack.c.bf16 %v4029_v11, %v4029_v11  ;;  %2712 = vmatprep.subr.bf16.mxu0 %v3447_v9 }
 0x2f3   : > { %v1366_v33 = vrot.slane %v1291_v31, %v1365_v32  ;;  %v2982_v32 = vld [vmem:[%s3982_s23] sm:$0xff]  }
 0x2f4   : > { %2703 = vmatmul.mubr.msk.bf16.vlgmr.msra.gmra.mrb[0].mxu0 %vm1317_vm4, %v1293_v12 }
 0x2f5   : > { %2714 = vmatprep.mubr.msk.bf16.mxu0 %vm3448_vm3, %v3447_v9  ;;  %p2638_p8 = scmp.ne.s32.totalorder %s4360_s6, 1 }
 0x2f6   : > { %s4361_s27 = scalar_lea.vmem (!%p2638_p8), [#allocation6], %s3908_s9  ;;  %vm3456_vm8 = vmmov (!%p2638_p8), 0   ;;  %s4362_s7 = sld [smem:[#allocation51_spill]] (!%p2638_p8) }
 0x2f7   : > { %s3458_s6 = smov (!%p2638_p8), 32   ;;  %s3460_s16 = smov (!%p2638_p8), 96  }
 0x2f8   : > { %s4364_s26 = sld [smem:[#allocation52_spill]] (!%p2638_p8) }
 0x2fe   : > { %s4365_s18 = smov (!%p2638_p8), %s4364_s26 }
 0x3c7   : > { %v1355_v15 = vpop.f32.mrb[0].mxu0 }
 0x3c8   : > { %v1356_v16 = vadd.f32 %v2605_v14, %v1355_v15  ;;  %v2704_v17 = vpop.f32.mrb[1].mxu0 }
 0x3c9   : > { %v1358_v18 = vpop.f32.mrb[2].mxu0  ;;  %v2613_v17 = vld [vmem:[%s3988_s17] ss:$0 sm:$0xff] }
 0x3ca   : > { %v1361_v19 = vpack.c.bf16 %v1356_v16, %v1356_v16  ;;  %v2705_v20 = vpop.f32.mrb[3].mxu0 }
 0x3cc   : > { %1479 = vrot.lane.b32.xlu1 %v1361_v19, %s3449_s11  ;;  %1369 = vrot.lane.b32.xlu0 %v1361_v19, %s3450_s8 }
 0x3d0   : > { %1481 = vrot.lane.b32.xlu0 %v1361_v19, %s3451_s5 }
 0x43e   : > { %v1370_v21 = vpop.permute.xlu0 %1369  ;;  %v1480_v26 = vpop.permute.xlu1 %1479 }
 0x43f   : > { %v1376_v22 = vsel %vm1371_vm5, %v1370_v21, 0 }
 0x440   : > { %2707 = vmatpush3.bf16.xpose.msra.mxu1 %v1376_v22 }
 0x441   : > { %2718 = vmatprep.subr.bf16.mxu1 %v3447_v9 }
 0x442   : > { %v1482_v23 = vpop.permute.xlu0 %1481 }
 0x443   : > { %v1487_v24 = vsel %vm1371_vm5, %v1482_v23, 0 }
 0x447   : > { %2709 = vmatmul.mubr.msk.bf16.vlgmr.msra.gmra.mrb[0].mxu1 %vm1371_vm5, %v1361_v19 }
 0x448   : > { %2719 = vmatpush3.bf16.xpose.msra.mxu1 %v1487_v24  ;;  %2720 = vmatprep.mubr.msk.bf16.mxu1 %vm3448_vm3, %v3447_v9 }
 0x449   : > { %2730 = vmatprep.subr.bf16.mxu1 %v3447_v9 }
 0x44f   : > { %2721 = vmatmul.mubr.msk.bf16.vlgmr.msra.gmra.mrb[4].mxu1 %vm1371_vm5, %v1480_v26 }
 0x450   : > { %2732 = vmatprep.mubr.msk.bf16.mxu1 %vm3448_vm3, %v3447_v9  ;;  %2731 = vmatpush3.bf16.msra.mxu1 %v2981_v2 }
 0x451   : > { %2744 = vmatprep.subr.bf16.mxu1 %v3447_v9 }
 0x51a   : > { %v1412_v34 = vpop.f32.mrb[0].mxu1 }
 0x51b   : > { %v1413_v35 = vadd.f32 %v1412_v34, %v1366_v33  ;;  %v2710_v36 = vpop.f32.mrb[1].mxu1 }
 0x51c   : > { %v1415_v37 = vpop.f32.mrb[2].mxu1 }
 0x51d   : > { %v2711_v38 = vpop.f32.mrb[3].mxu1  ;;  %v1418_v39 = vsel %vm1371_vm5, %v1413_v35, -inf  ;;  %v2618_v37 = vld [vmem:[%s3988_s17 + $0x3] ss:$0 sm:$0xff] }
 0x51e   : > { %1419 = vmax.xlane.f32.xlu1 %v1418_v39  ;;  %v2619_v39 = vld [vmem:[%s3988_s17 + $0x4] ss:$0 sm:$0xff] }
 0x522   : > { %v1523_v40 = vpop.f32.mrb[4].mxu1 }
 0x523   : > { %v1524_v41 = vadd.f32 %v1523_v40, %v1366_v33  ;;  %v2722_v42 = vpop.f32.mrb[5].mxu1  ;;  %v2983_v33 = vld [vmem:[%s3982_s23 + $0x8] sm:$0xff]  }
 0x524   : > { %v1526_v43 = vpop.f32.mrb[6].mxu1 }
 0x525   : > { %v2723_v44 = vpop.f32.mrb[7].mxu1  ;;  %v1529_v45 = vsel %vm1371_vm5, %v1524_v41, -inf  ;;  %v2984_v43 = vld [vmem:[%s3982_s23 + $0x10] sm:$0xff]  }
 0x526   : > { %1530 = vmax.xlane.f32.xlu0 %v1529_v45  ;;  %v2985_v44 = vld [vmem:[%s3982_s23 + $0x18] sm:$0xff]   ;;  %v2621_v45 = vld [vmem:[%s3988_s17 + $0x1] ss:$0 sm:$0xff] }
 0x5ab   : > { %v1420_v46 = vpop.xlane.xlu1 %1419 }
 0x5ac   : > { %v1421_v47 = vsub.f32 %v1413_v35, %v1420_v46 }
 0x5ae   : > { %v1422_v48 = vmul.f32 1.442695, %v1421_v47 }
 0x5b0   : > { %2986 = vpow2.f32 %v1422_v48 }
 0x5b3   : > { %v1531_v49 = vpop.xlane.xlu0 %1530 }
 0x5b4   : > { %v1532_v50 = vsub.f32 %v1524_v41, %v1531_v49 }
 0x5b6   : > { %v1533_v51 = vmul.f32 1.442695, %v1532_v50 }
 0x5b8   : > { %2988 = vpow2.f32 %v1533_v51 }
 0x5ba   : > { %v2987_v52 = vpop.eup %2986 }
 0x5bb   : > { %v1424_v25 = vsel %vm1371_vm5, %v2987_v52, 0.0 }
 0x5bc   : > { %1425 = vadd.xlane.f32.xlu0 %v1424_v25  ;;  %v2630_v25 = vld [vmem:[%s3988_s17 + $0x2] ss:$0 sm:$0xff] }
 0x5c2   : > { %v2989_v53 = vpop.eup %2988 }
 0x5c3   : > { %v1535_v54 = vsel %vm1371_vm5, %v2989_v53, 0.0 }
 0x5c4   : > { %1536 = vadd.xlane.f32.xlu1 %v1535_v54 }
 0x5d2   : > { %1430 = vrot.lane.b32.xlu0 %v1361_v19, %s3452_s4 }
 0x5d5   : > { %1541 = vrot.lane.b32.xlu1 %v1361_v19, %s3453_s22 }
 0x649   : > { %v1426_v55 = vpop.xlane.xlu0 %1425 }
 0x64a   : > { %2990 = vrcp.f32 %v1426_v55 }
 0x64d   : > { %v1431_v56 = vpop.permute.xlu0 %1430 }
 0x64e   : > { %v1437_v57 = vsel %vm1435_vm6, %v1431_v56, 0 }
 0x64f   : > { %2713 = vmatpush3.bf16.msra.mxu0 %v1437_v57 }
 0x650   : > { %2724 = vmatprep.subr.bf16.mxu0 %v3447_v9 }
 0x651   : > { %v1537_v58 = vpop.xlane.xlu1 %1536 }
 0x652   : > { %2992 = vrcp.f32 %v1537_v58 }
 0x654   : > { %v2991_v59 = vpop.eup %2990 }
 0x655   : > { %v1428_v60 = vmul.f32 %v2991_v59, %v2987_v52  ;;  %v1542_v61 = vpop.permute.xlu1 %1541 }
 0x656   : > { %v1547_v63 = vsel %vm1435_vm6, %v1542_v61, 0 }
 0x657   : > { %v1429_v62 = vpack.c.bf16 %v1428_v60, %v1428_v60 }
 0x659   : > { %2715 = vmatmul.mubr.msk.bf16.vlgmr.msra.gmra.mrb[4].mxu0 %vm1371_vm5, %v1429_v62 }
 0x65a   : > { %2725 = vmatpush3.bf16.msra.mxu0 %v1547_v63  ;;  %2726 = vmatprep.mubr.msk.bf16.mxu0 %vm3448_vm3, %v3447_v9 }
 0x65b   : > { %2736 = vmatprep.subr.bf16.mxu0 %v3447_v9 }
 0x65c   : > { %v2993_v0 = vpop.eup %2992 }
 0x65d   : > { %v1539_v7 = vmul.f32 %v2993_v0, %v2989_v53 }
 0x65f   : > { %v1540_v1 = vpack.c.bf16 %v1539_v7, %v1539_v7 }
 0x661   : > { %2727 = vmatmul.mubr.msk.bf16.vlgmr.msra.gmra.mrb[8].mxu0 %vm1371_vm5, %v1540_v1 }
 0x662   : > { %2740 = vmatprep.mubr.msk.bf16.mxu0 %vm3448_vm3, %v3447_v9  ;;  %2737 = vmatpush3.bf16.msra.mxu0 %v2982_v32 }
 0x663   : > { %2738 = vmatprep.subr.bf16.mxu0 %v3447_v9 }
 0x666   : > { %2739 = vmatpush3.bf16.msra.mxu0 %v2983_v33 }
 0x72c   : > { %v1473_v3 = vpop.f32.mrb[4].mxu0 }
 0x72d   : > { %v2716_v4 = vpop.f32.mrb[5].mxu0 }
 0x72e   : > { %v1476_v5 = vpop.f32.mrb[6].mxu0 }
 0x72f   : > { %v2717_v6 = vpop.f32.mrb[7].mxu0  ;;  %v2637_v5 = vld [vmem:[%s3988_s17 + $0x6] ss:$0 sm:$0xff] }
 0x734   : > { %v1583_v13 = vpop.f32.mrb[8].mxu0 }
 0x735   : > { %1590 = vrot.lane.b32.xlu1 %v1583_v13, %s3454_s12  ;;  %v2728_v8 = vpop.f32.mrb[9].mxu0  ;;  %s4363_s12 = sld [smem:[#allocation49_spill]] (!%p2638_p8) }
 0x736   : > { %v1586_v10 = vpop.f32.mrb[10].mxu0  ;;  %v1864_v8 = vld [vmem:[#allocation15] sm:$0xf] (!%p2638_p8) }
 0x737   : > { %v2729_v12 = vpop.f32.mrb[11].mxu0  ;;  %v1862_v10 = vld [vmem:[%s4361_s27] sm:$0x1] (!%p2638_p8)  ;;  %s3459_s27 = smov (!%p2638_p8), 64  }
 0x738   : > { %v3455_v12 = vmov (!%p2638_p8), 0.0  }
 0x739   : > { %2752 = vmatprep.subr.bf16.mxu0 (!%p2638_p8), %v3455_v12 }
 0x7a7   : > { %v1591_v14 = vpop.permute.xlu1 %1590 }
 0x7a8   : > { %v1593_v15 = vsel %vm1371_vm5, %v1473_v3, %v1591_v14  ;;  %v2636_v3 = vld [vmem:[%s3988_s17 + $0x5] ss:$0 sm:$0xff]  ;;  %v1870_v14 = vsel (!%p2638_p8), %vm1435_vm6, %v1864_v8, 0  ;;  %v3008_v8 = vld [vmem:[%s4362_s7 + $0x48] sm:$0xff] (!%p2638_p8)  }
 0x7a9   : > { %v1594_v16 = vpack.c.bf16 %v1593_v15, %v1593_v15  ;;  %v1863_v15 = vpack.c.bf16 (!%p2638_p8), %v1862_v10, %v1862_v10 }
 0x7ab   : > { %2733 = vmatmul.mubr.msk.bf16.vlgmr.msra.gmra.mrb[8].mxu1 %vm1610_vm7, %v1594_v16 }
 0x7ac   : > { %2748 = vmatprep.mubr.msk.bf16.mxu1 %vm3448_vm3, %v3447_v9  ;;  %2745 = vmatpush3.bf16.msra.mxu1 %v2984_v43  ;;  %v3006_v43 = vld [vmem:[%s4362_s7 + $0x40] sm:$0xff] (!%p2638_p8)  }
 0x7ad   : > { %2746 = vmatprep.subr.bf16.mxu1 %v3447_v9 }
 0x7b0   : > { %2747 = vmatpush3.bf16.msra.mxu1 %v2985_v44  ;;  %v3007_v44 = vld [vmem:[%s4363_s12] sm:$0xff] (!%p2638_p8)  }
 0x87e   : > { %v1648_v18 = vpop.f32.mrb[8].mxu1 }
 0x87f   : > { %v1649_v19 = vadd.f32 %v2613_v17, %v1648_v18  ;;  %v2734_v20 = vpop.f32.mrb[9].mxu1  ;;  %v2998_v17 = vld [vmem:[%s4362_s7] sm:$0xff] (!%p2638_p8)  }
 0x880   : > { %v1651_v21 = vpop.f32.mrb[10].mxu1  ;;  %v2999_v20 = vld [vmem:[%s4362_s7 + $0x8] sm:$0xff] (!%p2638_p8)  }
 0x881   : > { %v2735_v22 = vpop.f32.mrb[11].mxu1  ;;  %v1654_v23 = vadd.f32 %v1649_v19, %v4029_v11  ;;  %v3457_v19 = vmov (!%p2638_p8), 0  }
 0x882   : > { %2173 = vmatprep.subr.bf16.mxu1 (!%p2638_p8), %v3457_v19 }
 0x883   : > { %v1659_v24 = vsel %vm1317_vm4, %v1654_v23, 0.0 }
 0x884   : > { %1660 = vadd.xlane.f32.xlu0 %v1659_v24 }
 0x911   : > { %v1661_v26 = vpop.xlane.xlu0 %1660 }
 0x912   : > { %v1663_v27 = vmul.f32 0.03125, %v1661_v26 }
 0x914   : > { %v1664_v28 = vsub.f32 %v1654_v23, %v1663_v27  ;;  %v3000_v23 = vld [vmem:[%s4362_s7 + $0x10] sm:$0xff] (!%p2638_p8)   ;;  %v3001_v27 = vld [vmem:[%s4362_s7 + $0x18] sm:$0xff] (!%p2638_p8)  }
 0x916   : > { %v1665_v29 = vmul.f32 %v1664_v28, %v1664_v28 }
 0x918   : > { %v1666_v31 = vsel %vm1317_vm4, %v1665_v29, 0.0 }
 0x919   : > { %1667 = vadd.xlane.f32.xlu1 %v1666_v31  ;;  %v3002_v31 = vld [vmem:[%s4362_s7 + $0x20] sm:$0xff] (!%p2638_p8)  }
 0x9a6   : > { %v1668_v11 = vpop.xlane.xlu1 %1667 }
 0x9a7   : > { %v1669_v34 = vmul.f32 0.03125, %v1668_v11  ;;  %v3003_v11 = vld [vmem:[%s4362_s7 + $0x28] sm:$0xff] (!%p2638_p8)  }
 0x9a9   : > { %v1670_v35 = vadd.f32 1e-05, %v1669_v34 }
 0x9ab   : > { %2994 = vrsqrt.f32 %v1670_v35 }
 0x9b5   : > { %v2995_v36 = vpop.eup %2994 }
 0x9b6   : > { %v1672_v38 = vmul.f32 %v2995_v36, %v1664_v28  ;;  %v3004_v36 = vld [vmem:[%s4362_s7 + $0x30] sm:$0xff] (!%p2638_p8)  }
 0x9b8   : > { %v1679_v40 = vmul.f32 %v2618_v37, %v1672_v38 }
 0x9ba   : > { %v1686_v41 = vadd.f32 %v2619_v39, %v1679_v40  ;;  %v3005_v39 = vld [vmem:[%s4362_s7 + $0x38] sm:$0xff] (!%p2638_p8)  }
 0x9bc   : > { %v1687_v42 = vpack.c.bf16 %v1686_v41, %v1686_v41 }
 0x9be   : > { %2741 = vmatmul.mubr.msk.bf16.vlgmr.msra.gmra.mrb[12].mxu0 %vm1317_vm4, %v1687_v42 }
 0x9bf   : > { %2754 = vmatprep.mubr.msk.bf16.mxu0 (!%p2638_p8), %vm3456_vm8, %v3455_v12  ;;  %2753 = vmatpush3.bf16.msra.mxu0 (!%p2638_p8), %v1870_v14 }
 0x9c0   : > { %2758 = vmatprep.subr.bf16.mxu0 (!%p2638_p8), %v3455_v12 }
 0x9c6   : > { %2755 = vmatmul.mubr.msk.bf16.vlgmr.msra.gmra.mrb[0].mxu0 (!%p2638_p8), %vm1371_vm5, %v1863_v15  ;;  %v3009_v15 = vld [vmem:[%s4363_s12 + $0x8] sm:$0xff] (!%p2638_p8)  }
 0x9c7   : > { %2762 = vmatprep.mubr.msk.bf16.mxu0 (!%p2638_p8), %vm3456_vm8, %v3455_v12  ;;  %2759 = vmatpush3.bf16.msra.mxu0 (!%p2638_p8), %v3007_v44  ;;  %v1865_v44 = vld [vmem:[#allocation17] sm:$0x1] (!%p2638_p8) }
 0x9c8   : > { %2760 = vmatprep.subr.bf16.mxu0 (!%p2638_p8), %v3455_v12 }
 0x9cb   : > { %2761 = vmatpush3.bf16.msra.mxu0 (!%p2638_p8), %v3009_v15 }
 0x9cc   : > { %2766 = vmatprep.subr.bf16.mxu0 (!%p2638_p8), %v3455_v12 }
 0xa91   : > { %v1749_v46 = vpop.f32.mrb[12].mxu0 }
 0xa92   : > { %v1750_v47 = vadd.f32 %v2621_v45, %v1749_v46  ;;  %v2742_v48 = vpop.f32.mrb[13].mxu0 }
 0xa93   : > { %v1752_v49 = vpop.f32.mrb[14].mxu0 }
 0xa94   : > { %v1755_v50 = vmax.f32 %v1750_v47, 0.0  ;;  %v2743_v51 = vpop.f32.mrb[15].mxu0 }
 0xa96   : > { %v1756_v52 = vpack.c.bf16 %v1755_v50, %v1755_v50 }
 0xa98   : > { %2749 = vmatmul.mubr.msk.bf16.vlgmr.msra.gmra.mrb[12].mxu1 %vm1317_vm4, %v1756_v52 }
 0xa99   : > { %2174 = vmatpush1.bf16.msra.mxu1 (!%p2638_p8), %v2998_v17 }
 0xa9a   : > { %2175 = vmatprep.subr.bf16.mxu1 (!%p2638_p8), %v3457_v19 }
 0xa9d   : > { %2176 = vmatpush1.bf16.msra.mxu1 (!%p2638_p8), %v2999_v20 }
 0xa9e   : > { %2177 = vmatprep.subr.bf16.mxu1 (!%p2638_p8), %v3457_v19 }
 0xaa1   : > { %2178 = vmatpush1.bf16.msra.mxu1 (!%p2638_p8), %v3000_v23 }
 0xaa2   : > { %2179 = vmatprep.subr.bf16.mxu1 (!%p2638_p8), %v3457_v19 }
 0xaa5   : > { %2180 = vmatpush1.bf16.msra.mxu1 (!%p2638_p8), %v3001_v27 }
 0xaa6   : > { %2181 = vmatprep.subr.bf16.mxu1 (!%p2638_p8), %v3457_v19 }
 0xaa9   : > { %2182 = vmatpush1.bf16.msra.mxu1 (!%p2638_p8), %v3002_v31 }
 0xaaa   : > { %2183 = vmatprep.subr.bf16.mxu1 (!%p2638_p8), %v3457_v19 }
 0xaad   : > { %2184 = vmatpush1.bf16.msra.mxu1 (!%p2638_p8), %v3003_v11 }
 0xaae   : > { %2185 = vmatprep.subr.bf16.mxu1 (!%p2638_p8), %v3457_v19 }
 0xab1   : > { %2186 = vmatpush1.bf16.msra.mxu1 (!%p2638_p8), %v3004_v36 }
 0xab2   : > { %2187 = vmatprep.subr.bf16.mxu1 (!%p2638_p8), %v3457_v19 }
 0xab5   : > { %2188 = vmatpush1.bf16.msra.mxu1 (!%p2638_p8), %v3005_v39 }
 0xab6   : > { %2189 = vmatprep.subr.bf16.mxu1 (!%p2638_p8), %v3457_v19 }
 0xab9   : > { %2190 = vmatpush1.bf16.msra.mxu1 (!%p2638_p8), %v3006_v43 }
 0xaba   : > { %2191 = vmatprep.subr.bf16.mxu1 (!%p2638_p8), %v3457_v19 }
 0xabd   : > { %2192 = vmatpush1.bf16.msra.mxu1 (!%p2638_p8), %v3008_v8 }
 0xb6b   : > { %v1819_v53 = vpop.f32.mrb[12].mxu1 }
 0xb6c   : > { %v1820_v54 = vadd.f32 %v2630_v25, %v1819_v53  ;;  %v2750_v55 = vpop.f32.mrb[13].mxu1 }
 0xb6d   : > { %v1822_v56 = vpop.f32.mrb[14].mxu1 }
 0xb6e   : > { %v2751_v57 = vpop.f32.mrb[15].mxu1  ;;  %v1825_v9 = vadd.f32 %v1820_v54, %v1686_v41 }
 0xb70   : > { %v1830_v58 = vsel %vm1317_vm4, %v1825_v9, 0.0 }
 0xb71   : > { %1831 = vadd.xlane.f32.xlu0 %v1830_v58 }
 0xbfe   : > { %v1832_v59 = vpop.xlane.xlu0 %1831 }
 0xbff   : > { %v1833_v60 = vmul.f32 0.03125, %v1832_v59 }
 0xc01   : > { %v1834_v61 = vsub.f32 %v1825_v9, %v1833_v60 }
 0xc03   : > { %v1835_v62 = vmul.f32 %v1834_v61, %v1834_v61 }
 0xc05   : > { %v1836_v63 = vsel %vm1317_vm4, %v1835_v62, 0.0 }
 0xc06   : > { %1837 = vadd.xlane.f32.xlu0 %v1836_v63 }
 0xc93   : > { %v1838_v0 = vpop.xlane.xlu0 %1837 }
 0xc94   : > { %v1839_v7 = vmul.f32 0.03125, %v1838_v0 }
 0xc96   : > { %v1840_v1 = vadd.f32 1e-05, %v1839_v7 }
 0xc98   : > { %2996 = vrsqrt.f32 %v1840_v1 }
 0xca2   : > { %v2997_v2 = vpop.eup %2996 }
 0xca3   : > { %v1842_v4 = vmul.f32 %v2997_v2, %v1834_v61  ;;  %1861 = sbr.rel (%p2638_p8) target bundleno = 3921 (0xf51), region = 152 }
 0xca5   : > { %v1849_v6 = vmul.f32 %v2636_v3, %v1842_v4 }
 0xca7   : > { %v1856_v13 = vadd.f32 %v2637_v5, %v1849_v6 }
 0xca9   : > { %1857 = vst.msk [vmem:[#allocation2] sm:$0xff] %vm1317_vm4, %v1856_v13  ;;  %v1977_v16 = vsel (!%p2638_p8), %vm1317_vm4, %v1856_v13, -inf }
 0xcaa   : > { %v1978_v18 = vrot.slane %v1977_v16, 4 }
 0xcac   : > { %v1979_v21 = vmax.f32 %v1977_v16, %v1978_v18 }
 0xcae   : > { %v1980_v22 = vrot.slane %v1979_v21, 2 }
 0xcb0   : > { %v1981_v24 = vmax.f32 %v1979_v21, %v1980_v22 }
 0xcb2   : > { %v1982_v26 = vrot.slane %v1981_v24, 1 }
 0xcb4   : > { %v4124_v28 = vmax.f32 %v1981_v24, %v1982_v26 }
 0xcb6   : > { %vm1984_vm9 = vcmp.eq.f32.partialorder %v1856_v13, %v4124_v28 }
 0xcb7   : > { %v1985_v29 = vsel %vm1984_vm9, %v4057_v30, 8 }
 0xcb8   : > { %v1986_v32 = vsel %vm1317_vm4, %v1985_v29, 2147483647 }
 0xcb9   : > { %v1987_v33 = vrot.slane %v1986_v32, 4 }
 0xcbb   : > { %vm1988_vm10 = vcmp.lt.s32.totalorder %v1986_v32, %v1987_v33 }
 0xcbc   : > { %v1989_v34 = vsel %vm1988_vm10, %v1986_v32, %v1987_v33 }
 0xcbd   : > { %v1990_v35 = vrot.slane %v1989_v34, 2 }
 0xcbf   : > { %vm1991_vm11 = vcmp.lt.s32.totalorder %v1989_v34, %v1990_v35 }
 0xcc0   : > { %v1992_v37 = vsel %vm1991_vm11, %v1989_v34, %v1990_v35 }
 0xcc1   : > { %v1993_v38 = vrot.slane %v1992_v37, 1 }
 0xcc3   : > { %vm1994_vm12 = vcmp.lt.s32.totalorder %v1992_v37, %v1993_v38 }
 0xcc4   : > { %v1995_v40 = vsel %vm1994_vm12, %v1992_v37, %v1993_v38 }
 0xcc5   : > { %vm1996_vm13 = vcmp.eq.s32.totalorder %v4057_v30, %v1995_v40 }
 0xcc6   : > { %v1997_v41 = vsel %vm1996_vm13, -inf, %v1856_v13 }
 0xcc7   : > { %v1998_v42 = vsel %vm1317_vm4, %v1997_v41, -inf }
 0xcc8   : > { %v1999_v45 = vrot.slane %v1998_v42, 4 }
 0xcca   : > { %v2000_v46 = vmax.f32 %v1998_v42, %v1999_v45  ;;  %v1906_v45 = vpop.f32.mrb[0].mxu0 }
 0xccc   : > { %v2001_v47 = vrot.slane %v2000_v46, 2 }
 0xcce   : > { %v2002_v48 = vmax.f32 %v2000_v46, %v2001_v47  ;;  %v1907_v46 = vadd.f32 %v1906_v45, %v1865_v44  ;;  %v2756_v47 = vpop.f32.mrb[1].mxu0 }
 0xcd0   : > { %v2003_v49 = vrot.slane %v2002_v48, 1 }
 0xcd2   : > { %v2004_v50 = vmax.f32 %v2002_v48, %v2003_v49  ;;  %v1909_v49 = vpop.f32.mrb[2].mxu0 }
 0xcd4   : > { %2069 = vrot.lane.b32.xlu0 %v2004_v50, %s3458_s6  ;;  %vm2005_vm14 = vcmp.eq.f32.partialorder %v1997_v41, %v2004_v50  ;;  %v1912_v50 = vmax.f32 %v1907_v46, 0.0 }
 0xcd5   : > { %v2006_v51 = vsel %vm2005_vm14, %v4057_v30, 8 }
 0xcd6   : > { %v2007_v52 = vsel %vm1317_vm4, %v2006_v51, 2147483647 }
 0xcd7   : > { %v2008_v25 = vrot.slane %v2007_v52, 4 }
 0xcd9   : > { %vm2009_vm15 = vcmp.lt.s32.totalorder %v2007_v52, %v2008_v25 }
 0xcda   : > { %v2010_v53 = vsel %vm2009_vm15, %v2007_v52, %v2008_v25  ;;  %vm2081_vm15 = vcmask 523264   ;;  %v2757_v52 = vpop.f32.mrb[3].mxu0 }
 0xcdb   : > { %v2011_v54 = vrot.slane %v2010_v53, 2 }
 0xcdd   : > { %vm2012_vm0 = vcmp.lt.s32.totalorder %v2010_v53, %v2011_v54 }
 0xcde   : > { %v2013_v55 = vsel %vm2012_vm0, %v2010_v53, %v2011_v54  ;;  %vm2083_vm0 = vcmask 785408   ;;  %v1913_v53 = vpack.c.bf16 %v1912_v50, %v1912_v50  ;;  %v3011_v54 = vld [vmem:[%s4365_s18 + $0x8] sm:$0xff]  }
 0xcdf   : > { %v2014_v56 = vrot.slane %v2013_v55, 1 }
 0xce0   : > { %2763 = vmatmul.mubr.msk.bf16.vlgmr.msra.gmra.mrb[4].mxu0 %vm1317_vm4, %v1913_v53 }
 0xce1   : > { %vm2015_vm1 = vcmp.lt.s32.totalorder %v2013_v55, %v2014_v56  ;;  %2770 = vmatprep.mubr.msk.bf16.mxu0 %vm3456_vm8, %v3455_v12 }
 0xce2   : > { %v2016_v57 = vsel %vm2015_vm1, %v2013_v55, %v2014_v56  ;;  %v1919_v55 = vld [vmem:[#allocation17 + $0x1] sm:$0x1] }
 0xce3   : > { %vm2017_vm2 = vcmp.eq.s32.totalorder %v4057_v30, %v2016_v57 }
 0xce4   : > { %v2018_v9 = vsel %vm2017_vm2, -inf, %v1997_v41 }
 0xce5   : > { %v2019_v58 = vsel %vm1317_vm4, %v2018_v9, -inf }
 0xce6   : > { %v2020_v59 = vrot.slane %v2019_v58, 4 }
 0xce8   : > { %v2021_v60 = vmax.f32 %v2019_v58, %v2020_v59  ;;  %v2086_v58 = vld [vmem:[#allocation17 + $0x2] sm:$0x1] }
 0xcea   : > { %v2022_v61 = vrot.slane %v2021_v60, 2 }
 0xcec   : > { %v2023_v62 = vmax.f32 %v2021_v60, %v2022_v61 }
 0xcee   : > { %v2024_v63 = vrot.slane %v2023_v62, 1 }
 0xcf0   : > { %v2025_v0 = vmax.f32 %v2023_v62, %v2024_v63 }
 0xcf2   : > { %2073 = vrot.lane.b32.xlu0 %v2025_v0, %s3459_s27  ;;  %vm2026_vm3 = vcmp.eq.f32.partialorder %v2018_v9, %v2025_v0 }
 0xcf3   : > { %v2027_v7 = vsel %vm2026_vm3, %v4057_v30, 8 }
 0xcf4   : > { %v2028_v1 = vsel %vm1317_vm4, %v2027_v7, 2147483647 }
 0xcf5   : > { %v2029_v2 = vrot.slane %v2028_v1, 4 }
 0xcf7   : > { %vm2030_vm5 = vcmp.lt.s32.totalorder %v2028_v1, %v2029_v2 }
 0xcf8   : > { %v2031_v3 = vsel %vm2030_vm5, %v2028_v1, %v2029_v2  ;;  %v2219_v2 = vld [vmem:[#allocation18] sm:$0x1] }
 0xcf9   : > { %v2032_v4 = vrot.slane %v2031_v3, 2 }
 0xcfb   : > { %vm2033_vm6 = vcmp.lt.s32.totalorder %v2031_v3, %v2032_v4 }
 0xcfc   : > { %v2034_v5 = vsel %vm2033_vm6, %v2031_v3, %v2032_v4 }
 0xcfd   : > { %v2035_v6 = vrot.slane %v2034_v5, 1 }
 0xcff   : > { %vm2036_vm7 = vcmp.lt.s32.totalorder %v2034_v5, %v2035_v6 }
 0xd00   : > { %v2037_v13 = vsel %vm2036_vm7, %v2034_v5, %v2035_v6 }
 0xd01   : > { %vm2038_vm9 = vcmp.eq.s32.totalorder %v4057_v30, %v2037_v13 }
 0xd02   : > { %v2039_v10 = vsel %vm2038_vm9, -inf, %v2018_v9 }
 0xd03   : > { %v2040_v14 = vsel %vm1317_vm4, %v2039_v10, -inf }
 0xd04   : > { %v2041_v16 = vrot.slane %v2040_v14, 4 }
 0xd06   : > { %v2042_v17 = vmax.f32 %v2040_v14, %v2041_v16 }
 0xd08   : > { %v2043_v18 = vrot.slane %v2042_v17, 2 }
 0xd0a   : > { %v2044_v19 = vmax.f32 %v2042_v17, %v2043_v18 }
 0xd0c   : > { %v2045_v20 = vrot.slane %v2044_v19, 1 }
 0xd0e   : > { %v2046_v21 = vmax.f32 %v2044_v19, %v2045_v20 }
 0xd10   : > { %2077 = vrot.lane.b32.xlu1 %v2046_v21, %s3460_s16  ;;  %vm2047_vm10 = vcmp.eq.f32.partialorder %v2039_v10, %v2046_v21 }
 0xd11   : > { %v2048_v22 = vsel %vm2047_vm10, %v4057_v30, 8 }
 0xd12   : > { %v2049_v23 = vsel %vm1317_vm4, %v2048_v22, 2147483647 }
 0xd13   : > { %v2050_v24 = vrot.slane %v2049_v23, 4 }
 0xd15   : > { %vm2051_vm11 = vcmp.lt.s32.totalorder %v2049_v23, %v2050_v24 }
 0xd16   : > { %v2052_v26 = vsel %vm2051_vm11, %v2049_v23, %v2050_v24 }
 0xd17   : > { %v2053_v27 = vrot.slane %v2052_v26, 2 }
 0xd19   : > { %vm2054_vm12 = vcmp.lt.s32.totalorder %v2052_v26, %v2053_v27 }
 0xd1a   : > { %v2055_v29 = vsel %vm2054_vm12, %v2052_v26, %v2053_v27 }
 0xd1b   : > { %v2056_v31 = vrot.slane %v2055_v29, 1 }
 0xd1d   : > { %vm2057_vm13 = vcmp.lt.s32.totalorder %v2055_v29, %v2056_v31 }
 0xd1e   : > { %v2058_v32 = vsel %vm2057_vm13, %v2055_v29, %v2056_v31 }
 0xd1f   : > { %vm2059_vm14 = vcmp.eq.s32.totalorder %v4057_v30, %v2058_v32 }
 0xd20   : > { %v2060_v33 = vsel %vm2059_vm14, -inf, %v2039_v10 }
 0xd21   : > { %v2061_v11 = vsel %vm1317_vm4, %v2060_v33, -inf }
 0xd22   : > { %v2062_v34 = vrot.slane %v2061_v11, 4 }
 0xd24   : > { %v2063_v35 = vmax.f32 %v2061_v11, %v2062_v34 }
 0xd26   : > { %v2064_v36 = vrot.slane %v2063_v35, 2 }
 0xd28   : > { %v2065_v37 = vmax.f32 %v2063_v35, %v2064_v36 }
 0xd2a   : > { %v2066_v38 = vrot.slane %v2065_v37, 1 }
 0xd2c   : > { %v2067_v39 = vmax.f32 %v2065_v37, %v2066_v38 }
 0xd2e   : > { %v2089_v40 = vpack.c.bf16 %v2067_v39, %v2067_v39 }
 0xd30   : > { %2653 = vmatprep.mubr.msk.bf16.mxu1 %vm1317_vm4, %v2089_v40 }
 0xd46   : > { %v2070_v41 = vpop.permute.xlu0 %2069 }
 0xd47   : > { %v2080_v42 = vsel %vm1317_vm4, %v4124_v28, %v2070_v41  ;;  %v3010_v28 = vld [vmem:[%s4364_s26] sm:$0xff]  }
 0xd48   : > { %2767 = vmatpush3.bf16.msra.mxu0 %v3010_v28 }
 0xd49   : > { %2768 = vmatprep.subr.bf16.mxu0 %v3455_v12 }
 0xd4c   : > { %2769 = vmatpush3.bf16.msra.mxu0 %v3011_v54 }
 0xd64   : > { %v2074_v43 = vpop.permute.xlu0 %2073 }
 0xd65   : > { %v2082_v30 = vsel %vm2081_vm15, %v2080_v42, %v2074_v43 }
 0xd82   : > { %v2078_v48 = vpop.permute.xlu1 %2077 }
 0xd83   : > { %v2084_v51 = vsel %vm2083_vm0, %v2082_v30, %v2078_v48 }
 0xd84   : > { %v2088_v25 = vpack.c.bf16 %v2084_v51, %v2084_v51 }
 0xd86   : > { %2206 = vmatmul.mubr.bf16.vlgmr.msra.gmra.mrb[0].mxu1 %v2088_v25 }
 0xdb3   : > { %v1969_v9 = vpop.f32.mrb[4].mxu0 }
 0xdb4   : > { %v1970_v59 = vadd.f32 %v1969_v9, %v1919_v55  ;;  %v2764_v61 = vpop.f32.mrb[5].mxu0 }
 0xdb5   : > { %v1972_v63 = vpop.f32.mrb[6].mxu0 }
 0xdb6   : > { %v2087_v0 = vadd.f32 %v2086_v58, %v1970_v59  ;;  %v2765_v7 = vpop.f32.mrb[7].mxu0 }
 0xe59   : > { %v2207_v56 = vpop.f32.mrb[0].mxu1 }
 0xe5a   : > { %v2209_v57 = vpop.f32.mrb[1].mxu1  ;;  %v2213_v1 = vadd.f32 %v2207_v56, %v2087_v0 }
 0xe5b   : > { %v2210_v60 = vpop.f32.mrb[2].mxu1 }
 0xe5c   : > { %v2211_v62 = vpop.f32.mrb[3].mxu1  ;;  %v2214_v12 = vpack.c.bf16 %v2213_v1, %v2213_v1 }
 0xe5e   : > { %2771 = vmatmul.mubr.msk.bf16.vlgmr.msra.gmra.mrb[8].mxu0 %vm1317_vm4, %v2214_v12 }
 0xf31   : > { %v2269_v3 = vpop.f32.mrb[8].mxu0 }
 0xf32   : > { %v2270_v4 = vadd.f32 %v2269_v3, %v2219_v2  ;;  %v2772_v5 = vpop.f32.mrb[9].mxu0 }
 0xf33   : > { %v2272_v6 = vpop.f32.mrb[10].mxu0 }
 0xf34   : > { %v2275_v13 = vsub.f32 0.0, %v2270_v4  ;;  %v2773_v8 = vpop.f32.mrb[11].mxu0 }
 0xf36   : > { %v2276_v10 = vmul.f32 1.442695, %v2275_v13 }
 0xf38   : > { %3012 = vpow2.f32 %v2276_v10 }
 0xf42   : > { %v3013_v14 = vpop.eup %3012 }
 0xf43   : > { %v2278_v15 = vadd.f32 1.0, %v3013_v14 }
 0xf45   : > { %3014 = vrcp.f32 %v2278_v15 }
 0xf4f   : > { %v3015_v16 = vpop.eup %3014 }
 0xf50   : > { %2281 = vst [vmem:[%s925_s29] sm:$0x1] %v3015_v16 }
 0xf51 PF: > { %s4366_s24 = sld [smem:[#allocation31_spill]]  ;;  %s2295_s3 = sshll.u32 %s925_s29, 4  ;;  %s2296_s3 = int_to_ptr.vmem [resolvable:$true] %s2295_s3 }
 0xf52   : > { %s4367_s8 = sld [smem:[#allocation59_spill]]  ;;  %s2283_s4 = scalar_lea.sflag [#allocation5], %s3908_s9 }
 0xf53   : > { %s3300_s22 = scalar_lea.vmem %s2296_s3, 16  ;;  %p4368_p7 = scmp.ne.s32.totalorder %s4326_s21, 0 }
 0xf54   : > { %p3301_p11 = scmp.ne.s32.totalorder %s2296_s3, %s3300_s22  ;;  %s3461_s6 = smov [#allocation20]  }
 0xf55   : > { %s3304_s27 = sshll.u32 %s3461_s6, 4  ;;  %s3305_s27 = int_to_ptr.vmem [resolvable:$false] %s3304_s27 }
 0xf56   : > { %p3302_p2 = pnand %p3301_p11, %p4368_p7  ;;  %s3306_s13 = scalar_lea.vmem %s3305_s27, 32 }
 0xf57   : > { %s2657_s10 = sshll.u32 %s4366_s24, 4  ;;  %p3307_p9 = scmp.lt.s32.totalorder %s2296_s3, %s3305_s27 }
 0xf58   : > { %s4189_s5 = scalar_lea.hbm %s4367_s8, %s2657_s10  ;;  %p3303_p6 = pneg %p3302_p2 }
 0xf59   : > { %p3308_p3 = scmp.lt.s32.totalorder %s3306_s13, %s3300_s22 }
 0xf5b   : > { %p3309_p10 = por %p3308_p3, %p3307_p9 }
 0xf5d   : > { %p3310_p5 = pnand %p3309_p10, %p3303_p6 }
 0xf5f   : > { %3313 = shalt.err (!%p3310_p5)
}
 0xf60   : > { %s3314_s9 = scalar_lea.hbm %s4189_s5, 16  ;;  %s3318_s23 = scalar_lea.hbm %s4367_s8, 32 }
 0xf61   : > { %p3315_p12 = scmp.ne.s32.totalorder %s4189_s5, %s3314_s9  ;;  %p3319_p13 = scmp.lt.u32.totalorder %s4189_s5, %s4367_s8 }
 0xf62   : > { %p3320_p1 = scmp.lt.u32.totalorder %s3318_s23, %s3314_s9  ;;  %p3322_p11 = scmp.lt.u32.totalorder %s3314_s9, %s4189_s5 }
 0xf63   : > { %p3316_p4 = pnand %p3315_p12, %p4368_p7 }
 0xf64   : > { %p3321_p8 = por %p3320_p1, %p3319_p13 }
 0xf65   : > { %p3317_p0 = pneg %p3316_p4 }
 0xf66   : > { %p3323_p2 = por %p3322_p11, %p3321_p8 }
 0xf68   : > { %p3324_p6 = pnand %p3323_p2, %p3317_p0 }
 0xf6a   : > { %3327 = shalt.err (!%p3324_p6)
}
 0xf6b   : > { %2818 = dma.vmem_to_hbm [thread:$0]  (%p4368_p7), %s2296_s3, 16, %s4189_s5, %s2283_s4  }
 0xf6c PF: > { %p2873_p9 = scmp.ge.s32.totalorder %s3422_s0, 2  ;;  %s2307_s14 = sand.u32 1, %s3394_s2  }
 0xf6d   : > { %p4369_p3 = scmp.ne.s32.totalorder %s4327_s1, 0  ;;  %s2308_s17 = scalar_lea.sflag [#allocation5], %s2307_s14 }
 0xf6f   : > { %p2853_p10 = pnand %p2873_p9, %p4369_p3 }
 0xf71   : > { %3389 = dma.done.wait (!%p2853_p10), %s2308_s17, 16  }
 0xf72   : > { %3391 = vsyncadd (!%p2853_p10), %s2308_s17, 4294967280  ;;  %s44_s0 = sadd.s32 1, %s3422_s0   ;;  %s4370_s26 = sld [smem:[#allocation29_spill]] }
 0xf73   : > { %p41_p5 = scmp.ge.s32.totalorder %s44_s0, 6   ;;  %s4371_s28 = sld [smem:[#allocation37_spill]] }
 0xf74   : > { %s4372_s27 = sld [smem:[#allocation32_spill]]  ;;  %s4373_s3 = sld [smem:[#allocation33_spill]] }
 0xf75   : > { %s4374_s21 = sld [smem:[#allocation35_spill]]  ;;  %s4375_s29 = sld [smem:[#allocation36_spill]] }
 0xf76   : > { %s4376_s2 = smov %s3398_s25  ;;  %43 = sbr.rel (!%p41_p5) target bundleno = 36 (0x24), region = 235 }
 0xf78   : > { %s4377_s25 = smov %s4370_s26 }
 0xf79   : > { %s4378_s26 = smov %s4371_s28 }
 0xf7b   : > { %s4379_s28 = smov %s4374_s21 }
 0xf7d   :  { %2312 = vsyncpa [#allocation4], 1 }
 0xf7e   :  { %2314 = vsyncpa [#allocation4 + $0x1], 1 }
 0xf7f   :  { %2315 = vsyncpa [#allocation7], 1 }
 0xf80   :  { %2317 = vsyncpa [#allocation7 + $0x1], 1 }
 0xf81   :  { %2318 = vsyncpa [#allocation10], 1 }
 0xf82   :  { %2319 = vsyncpa [#allocation13], 1 }
 0xf83   :  { %2320 = vsyncpa [#allocation16], 1 }
 0xf84   :  { %2321 = vsyncpa [#allocation19], 1 }
 0xf85   :  { %2322 = vsyncpa [#allocation5], 1 }
 0xf86   :  { %2324 = vsyncpa [#allocation5 + $0x1], 1 }

</bundles_post_ra>
